<compile_context>
chip_gen: v7x
topology: tpu7x:2x2x1
jax: 0.10.0
libtpu: 0.0.40
codegen_flags: <defaults>
</compile_context>

<pallas_src>
import jax
import jax.numpy as jnp
from jax.experimental import pallas as pl
from jax.experimental.pallas import tpu as pltpu

EPS = 1e-5  # nn.BatchNorm1d default eps
VMEM_LIMIT = 64 * 1024 * 1024  # budget against v7x's 64 MiB physical VMEM


def _pick_row_tile(n_rows, target=256):
    """Largest tile <= target that exactly divides n_rows (sublane-friendly)."""
    if n_rows <= target:
        return n_rows
    for tm in (512, 256, 128, 64, 32, 16):
        if tm <= target and n_rows % tm == 0:
            return tm
    return n_rows  # fall back to a single whole-array block


# ---------------------------------------------------------------------------
# feFinal:  Linear -> BN(folded) -> ReLU -> (Dropout: identity) -> Linear
# Row-tiled over the B*T rows; weights pinned, input slabs double-buffered.
# ---------------------------------------------------------------------------
def _fe_final_kernel(x_ref, w1_ref, b1_ref, w2_ref, b2_ref, o_ref):
    h = jnp.dot(x_ref[...], w1_ref[...], preferred_element_type=jnp.float32)
    h = jnp.maximum(h + b1_ref[...], 0.0)  # BN folded into w1/b1; ReLU
    o_ref[...] = jnp.dot(h.astype(w2_ref.dtype), w2_ref[...],
                         preferred_element_type=jnp.float32) + b2_ref[...]


def fe_final(x_flat, p):
    n, f = x_flat.shape
    fe_hidden = p["w1"].shape[1]
    emb = p["w2"].shape[1]
    tm = _pick_row_tile(n, target=256)
    return pl.pallas_call(
        _fe_final_kernel,
        out_shape=jax.ShapeDtypeStruct((n, emb), jnp.float32),
        grid=(n // tm,),
        in_specs=[
            pl.BlockSpec((tm, f), lambda i: (i, 0)),
            pl.BlockSpec((f, fe_hidden), lambda i: (0, 0)),
            pl.BlockSpec((1, fe_hidden), lambda i: (0, 0)),
            pl.BlockSpec((fe_hidden, emb), lambda i: (0, 0)),
            pl.BlockSpec((1, emb), lambda i: (0, 0)),
        ],
        out_specs=pl.BlockSpec((tm, emb), lambda i: (i, 0)),
        compiler_params=pltpu.CompilerParams(
            dimension_semantics=("parallel",),
            vmem_limit_bytes=VMEM_LIMIT),
    )(x_flat.astype(jnp.bfloat16), p["w1"], p["b1"], p["w2"], p["b2"])


# ---------------------------------------------------------------------------
# LSTM input projection for both directions: xW = x @ W_ih + b
# One big MXU-friendly bf16 matmul, grid=(direction, row_tiles), fully parallel.
# ---------------------------------------------------------------------------
def _lstm_proj_kernel(x_ref, w_ref, b_ref, o_ref):
    o_ref[0] = (jnp.dot(x_ref[...], w_ref[0],
                        preferred_element_type=jnp.float32) + b_ref[0])


def lstm_input_proj(x_flat, wih, b):
    # x_flat: (N, Din) f32; wih: (2, Din, 4H) bf16; b: (2, 1, 4H) f32
    n, din = x_flat.shape
    g4h = wih.shape[2]
    tm = _pick_row_tile(n, target=512)
    return pl.pallas_call(
        _lstm_proj_kernel,
        out_shape=jax.ShapeDtypeStruct((2, n, g4h), jnp.float32),
        grid=(2, n // tm),
        in_specs=[
            pl.BlockSpec((tm, din), lambda d, i: (i, 0)),
            pl.BlockSpec((1, din, g4h), lambda d, i: (d, 0, 0)),
            pl.BlockSpec((1, 1, g4h), lambda d, i: (d, 0, 0)),
        ],
        out_specs=pl.BlockSpec((1, tm, g4h), lambda d, i: (d, i, 0)),
        compiler_params=pltpu.CompilerParams(
            dimension_semantics=("parallel", "parallel"),
            vmem_limit_bytes=VMEM_LIMIT),
    )(x_flat.astype(jnp.bfloat16), wih, b)


# ---------------------------------------------------------------------------
# Bidirectional LSTM recurrence. grid=(direction, T); per-step xW tile and the
# (T, B, 2H) output column-block are streamed via BlockSpec; h/c in VMEM scratch.
# Backward direction is time-reversed purely through the index_maps.
# ---------------------------------------------------------------------------
def _lstm_recurrent_kernel(xw_ref, whh_ref, out_ref, h_sc, c_sc):
    t = pl.program_id(1)

    @pl.when(t == 0)
    def _():
        h_sc[...] = jnp.zeros_like(h_sc)
        c_sc[...] = jnp.zeros_like(c_sc)

    hdim = h_sc.shape[-1]
    gates = xw_ref[0, 0] + jnp.dot(h_sc[...].astype(jnp.bfloat16), whh_ref[0],
                                   preferred_element_type=jnp.float32)  # (B, 4H)
    i = jax.nn.sigmoid(gates[:, 0:hdim])
    f = jax.nn.sigmoid(gates[:, hdim:2 * hdim])
    g = jnp.tanh(gates[:, 2 * hdim:3 * hdim])
    o = jax.nn.sigmoid(gates[:, 3 * hdim:4 * hdim])
    c_new = f * c_sc[...] + i * g
    h_new = o * jnp.tanh(c_new)
    c_sc[...] = c_new
    h_sc[...] = h_new
    out_ref[0] = h_new


def lstm_bidir_layer(x_tbd, wih, whh, b):
    # x_tbd: (T, B, Din) f32 time-major; returns (T, B, 2H) f32 [fwd | bwd].
    T, B, din = x_tbd.shape
    H = whh.shape[1]
    assert H % 128 == 0, "hiddenDim must be a multiple of 128 for lane-aligned tiles"

    xw = lstm_input_proj(x_tbd.reshape(T * B, din), wih, b)  # (2, T*B, 4H) f32
    xw = xw.reshape(2, T, B, 4 * H)

    # time index: fwd -> t, bwd -> T-1-t
    def xw_map(d, t):
        return (d, t + d * (T - 1 - 2 * t), 0, 0)

    def out_map(d, t):
        return (t + d * (T - 1 - 2 * t), 0, d)

    return pl.pallas_call(
        _lstm_recurrent_kernel,
        out_shape=jax.ShapeDtypeStruct((T, B, 2 * H), jnp.float32),
        grid=(2, T),
        in_specs=[
            pl.BlockSpec((1, 1, B, 4 * H), xw_map),
            pl.BlockSpec((1, H, 4 * H), lambda d, t: (d, 0, 0)),
        ],
        out_specs=pl.BlockSpec((1, B, H), out_map),
        scratch_shapes=[pltpu.VMEM((B, H), jnp.float32),
                        pltpu.VMEM((B, H), jnp.float32)],
        compiler_params=pltpu.CompilerParams(
            dimension_semantics=("parallel", "arbitrary"),
            vmem_limit_bytes=VMEM_LIMIT),
    )(xw, whh)


# ---------------------------------------------------------------------------
# output_layers: Linear -> BN(folded) -> ReLU -> Linear -> BN(folded) -> ReLU
#                -> Linear    (Dropouts identity). Input is only (B, 2H): one call.
# ---------------------------------------------------------------------------
def _out_mlp_kernel(x_ref, w1, b1, w2, b2, w3, b3, o_ref):
    h = jnp.dot(x_ref[...], w1[...], preferred_element_type=jnp.float32) + b1[...]
    h = jnp.maximum(h, 0.0)
    h = jnp.dot(h.astype(w2.dtype), w2[...],
                preferred_element_type=jnp.float32) + b2[...]
    h = jnp.maximum(h, 0.0)
    o_ref[...] = jnp.dot(h.astype(w3.dtype), w3[...],
                         preferred_element_type=jnp.float32) + b3[...]


def output_layers(x, p):
    return pl.pallas_call(
        _out_mlp_kernel,
        out_shape=jax.ShapeDtypeStruct((x.shape[0], p["w3"].shape[1]), jnp.float32),
        in_specs=[pl.BlockSpec(memory_space=pltpu.MemorySpace.VMEM)] * 7,
        out_specs=pl.BlockSpec(memory_space=pltpu.MemorySpace.VMEM),
        compiler_params=pltpu.CompilerParams(vmem_limit_bytes=VMEM_LIMIT),
    )(x.astype(jnp.bfloat16), p["w1"], p["b1"], p["w2"], p["b2"], p["w3"], p["b3"])


# ---------------------------------------------------------------------------
# Parameter init (deterministic, synthetic, PyTorch-like layout) + preparation
# (fold inference BN into Linear, cast MXU weights to bf16, stack LSTM dirs).
# ---------------------------------------------------------------------------
def _linear(key, din, dout):
    kw, kb = jax.random.split(key)
    w = jax.random.normal(kw, (din, dout), jnp.float32) / jnp.sqrt(jnp.float32(din))
    b = jax.random.normal(kb, (1, dout), jnp.float32) * 0.01
    return w, b


def _bn(dim):
    return dict(g=jnp.ones((1, dim), jnp.float32),
                be=jnp.zeros((1, dim), jnp.float32),
                m=jnp.zeros((1, dim), jnp.float32),
                v=jnp.ones((1, dim), jnp.float32))


def init_params(key, noFeatures, feHidden, visEmb, lstmLayers, hiddenDim,
                clfHidden, noclasses):
    keys = jax.random.split(key, 64)
    ki = iter(keys)

    # feFinal
    w1, b1 = _linear(next(ki), noFeatures, feHidden)
    bn1 = _bn(feHidden)
    w2, b2 = _linear(next(ki), feHidden, visEmb)
    fe = dict(w1=w1, b1=b1, g1=bn1["g"], be1=bn1["be"], m1=bn1["m"], v1=bn1["v"],
              w2=w2, b2=b2)

    # bidirectional LSTM stack
    # TODO(synk): PyTorch keeps separate b_ih/b_hh; they are folded into one bias here.
    lstm = []
    for layer in range(lstmLayers):
        din = visEmb if layer == 0 else 2 * hiddenDim
        layer_p = {}
        for d in ("fwd", "bwd"):
            kw1, kw2, kb = jax.random.split(next(ki), 3)
            scale = 1.0 / jnp.sqrt(jnp.float32(hiddenDim))
            wih = jax.random.uniform(kw1, (din, 4 * hiddenDim), jnp.float32,
                                     -scale, scale)
            whh = jax.random.uniform(kw2, (hiddenDim, 4 * hiddenDim), jnp.float32,
                                     -scale, scale)
            b = jax.random.uniform(kb, (1, 4 * hiddenDim), jnp.float32,
                                   -scale, scale)
            layer_p[d] = dict(wih=wih, whh=whh, b=b)
        lstm.append(layer_p)

    # output_layers
    ow1, ob1 = _linear(next(ki), 2 * hiddenDim, hiddenDim)
    obn1 = _bn(hiddenDim)
    ow2, ob2 = _linear(next(ki), hiddenDim, clfHidden)
    obn2 = _bn(clfHidden)
    ow3, ob3 = _linear(next(ki), clfHidden, noclasses)
    out = dict(w1=ow1, b1=ob1, g1=obn1["g"], be1=obn1["be"], m1=obn1["m"], v1=obn1["v"],
               w2=ow2, b2=ob2, g2=obn2["g"], be2=obn2["be"], m2=obn2["m"], v2=obn2["v"],
               w3=ow3, b3=ob3)

    return dict(fe=fe, lstm=lstm, out=out)


def _fold_bn(w, b, g, be, m, v):
    scale = g * jax.lax.rsqrt(v + EPS)      # (1, d)
    return w * scale, (b - m) * scale + be


def prepare_params(params):
    """Fold inference BN into Linears, cast MXU weights to bf16, stack LSTM dirs."""
    fe = params["fe"]
    w1, b1 = _fold_bn(fe["w1"], fe["b1"], fe["g1"], fe["be1"], fe["m1"], fe["v1"])
    fe_p = dict(w1=w1.astype(jnp.bfloat16), b1=b1,
                w2=fe["w2"].astype(jnp.bfloat16), b2=fe["b2"])

    lstm_p = []
    for layer in params["lstm"]:
        wih = jnp.stack([layer["fwd"]["wih"], layer["bwd"]["wih"]], 0).astype(jnp.bfloat16)
        whh = jnp.stack([layer["fwd"]["whh"], layer["bwd"]["whh"]], 0).astype(jnp.bfloat16)
        bb = jnp.stack([layer["fwd"]["b"], layer["bwd"]["b"]], 0)  # (2, 1, 4H) f32
        lstm_p.append(dict(wih=wih, whh=whh, b=bb))

    out = params["out"]
    ow1, ob1 = _fold_bn(out["w1"], out["b1"], out["g1"], out["be1"], out["m1"], out["v1"])
    ow2, ob2 = _fold_bn(out["w2"], out["b2"], out["g2"], out["be2"], out["m2"], out["v2"])
    out_p = dict(w1=ow1.astype(jnp.bfloat16), b1=ob1,
                 w2=ow2.astype(jnp.bfloat16), b2=ob2,
                 w3=out["w3"].astype(jnp.bfloat16), b3=out["b3"])
    return dict(fe=fe_p, lstm=lstm_p, out=out_p)


# ---------------------------------------------------------------------------
# Full ApCB forward
# ---------------------------------------------------------------------------
def apcb_forward(x, prepared):
    B, T, F = x.shape
    xf = x.reshape(B * T, F)                        # view(B*T, F)
    v = fe_final(xf, prepared["fe"])                # (B*T, visEmb) f32
    E = v.shape[-1]
    seq = v.reshape(B, T, E).transpose(1, 0, 2)     # time-major (T, B, visEmb)

    inp = seq
    for layer in prepared["lstm"]:
        inp = lstm_bidir_layer(inp, layer["wih"], layer["whh"], layer["b"])  # (T, B, 2H)

    last = inp[-1]                                  # == x[:, -1] batch-first, (B, 2H)
    return output_layers(last, prepared["out"])     # (B, noclasses)


if __name__ == "__main__":
    # Small shapes consistent with the module's forward (real model:
    # noFeatures=2048, feHidden=1024, visEmb=512, hiddenDim=1024, clfHidden=512).
    B, T = 2, 8
    noFeatures = 256
    feHidden, visEmb = 256, 128
    lstmLayers, hiddenDim = 2, 128
    clfHidden, noclasses = 128, 16

    key = jax.random.PRNGKey(0)
    kx, kp = jax.random.split(key)
    x = jax.random.normal(kx, (B, T, noFeatures), jnp.float32)
    raw = init_params(kp, noFeatures, feHidden, visEmb, lstmLayers,
                      hiddenDim, clfHidden, noclasses)
    params = prepare_params(raw)

    out = jax.jit(apcb_forward)(x, params)
    out = jax.block_until_ready(out)
    assert out.shape == (B, noclasses), out.shape
    assert bool(jnp.all(jnp.isfinite(out)))
    print("KERNEL_OK")
</pallas_src>

<mosaic_0001>
module attributes {stable_mosaic.version = 11 : i64} {
  func.func @_fe_final_kernel(%arg0: i32, %arg1: memref<16x256xbf16, #tpu.memory_space<vmem>>, %arg2: memref<256x256xbf16, #tpu.memory_space<vmem>>, %arg3: memref<1x256xf32, #tpu.memory_space<vmem>>, %arg4: memref<256x128xbf16, #tpu.memory_space<vmem>>, %arg5: memref<1x128xf32, #tpu.memory_space<vmem>>, %arg6: memref<16x128xf32, #tpu.memory_space<vmem>>) attributes {dimension_semantics = [#tpu.dimension_semantics<parallel>], iteration_bounds = array<i64: 1>, scalar_prefetch = 0 : i64, scratch_operands = 0 : i64, tpu.core_type = #tpu.core_type<tc>, window_params = [{transform_indices = @transform_0, window_bounds = array<i64: 16, 256>}, {pipeline_mode = #tpu.pipeline_mode<synchronous>, transform_indices = @transform_1, window_bounds = array<i64: 256, 256>}, {pipeline_mode = #tpu.pipeline_mode<synchronous>, transform_indices = @transform_2, window_bounds = array<i64: 1, 256>}, {pipeline_mode = #tpu.pipeline_mode<synchronous>, transform_indices = @transform_3, window_bounds = array<i64: 256, 128>}, {pipeline_mode = #tpu.pipeline_mode<synchronous>, transform_indices = @transform_4, window_bounds = array<i64: 1, 128>}, {transform_indices = @transform_5, window_bounds = array<i64: 16, 128>}]} {
    %c0 = arith.constant 0 : index
    %c0_0 = arith.constant 0 : index
    %0 = vector.load %arg1[%c0, %c0_0] : memref<16x256xbf16, #tpu.memory_space<vmem>>, vector<16x256xbf16>
    %c0_1 = arith.constant 0 : index
    %c0_2 = arith.constant 0 : index
    %1 = vector.load %arg2[%c0_1, %c0_2] : memref<256x256xbf16, #tpu.memory_space<vmem>>, vector<256x256xbf16>
    %cst = arith.constant dense<0.000000e+00> : vector<16x256xf32>
    %2 = tpu.matmul %0, %1, %cst {dimension_numbers = #tpu.dot_dimension_numbers<[1], [0], [0], [1], [0, 0, 1, 1], [], []>} : vector<16x256xbf16>, vector<256x256xbf16>, vector<16x256xf32> -> vector<16x256xf32>
    %c0_3 = arith.constant 0 : index
    %c0_4 = arith.constant 0 : index
    %3 = vector.load %arg3[%c0_3, %c0_4] : memref<1x256xf32, #tpu.memory_space<vmem>>, vector<1x256xf32>
    %4 = vector.broadcast %3 : vector<1x256xf32> to vector<16x256xf32>
    %5 = arith.addf %2, %4 : vector<16x256xf32>
    %cst_5 = arith.constant 0.000000e+00 : f32
    %6 = vector.broadcast %cst_5 : f32 to vector<16x256xf32>
    %7 = arith.maximumf %5, %6 : vector<16x256xf32>
    %8 = arith.truncf %7 : vector<16x256xf32> to vector<16x256xbf16>
    %c0_6 = arith.constant 0 : index
    %c0_7 = arith.constant 0 : index
    %9 = vector.load %arg4[%c0_6, %c0_7] : memref<256x128xbf16, #tpu.memory_space<vmem>>, vector<256x128xbf16>
    %cst_8 = arith.constant dense<0.000000e+00> : vector<16x128xf32>
    %10 = tpu.matmul %8, %9, %cst_8 {dimension_numbers = #tpu.dot_dimension_numbers<[1], [0], [0], [1], [0, 0, 1, 1], [], []>} : vector<16x256xbf16>, vector<256x128xbf16>, vector<16x128xf32> -> vector<16x128xf32>
    %c0_9 = arith.constant 0 : index
    %c0_10 = arith.constant 0 : index
    %11 = vector.load %arg5[%c0_9, %c0_10] : memref<1x128xf32, #tpu.memory_space<vmem>>, vector<1x128xf32>
    %12 = vector.broadcast %11 : vector<1x128xf32> to vector<16x128xf32>
    %13 = arith.addf %10, %12 : vector<16x128xf32>
    %c0_11 = arith.constant 0 : index
    %c0_12 = arith.constant 0 : index
    %14 = vector.load %arg6[%c0_11, %c0_12] : memref<16x128xf32, #tpu.memory_space<vmem>>, vector<16x128xf32>
    tpu.vector_store %arg6[%c0_11, %c0_12], %13 {strides = array<i32>} : memref<16x128xf32, #tpu.memory_space<vmem>>, vector<16x128xf32>,
    return
  }
  func.func @transform_0(%arg0: i32) -> (i32, i32) {
    %c0_i32 = arith.constant 0 : i32
    %c0_i32_0 = arith.constant 0 : i32
    return %arg0, %c0_i32 : i32, i32
  }
  func.func @transform_1(%arg0: i32) -> (i32, i32) {
    %c0_i32 = arith.constant 0 : i32
    %c0_i32_0 = arith.constant 0 : i32
    %c0_i32_1 = arith.constant 0 : i32
    return %c0_i32, %c0_i32_0 : i32, i32
  }
  func.func @transform_2(%arg0: i32) -> (i32, i32) {
    %c0_i32 = arith.constant 0 : i32
    %c0_i32_0 = arith.constant 0 : i32
    %c0_i32_1 = arith.constant 0 : i32
    return %c0_i32, %c0_i32_0 : i32, i32
  }
  func.func @transform_3(%arg0: i32) -> (i32, i32) {
    %c0_i32 = arith.constant 0 : i32
    %c0_i32_0 = arith.constant 0 : i32
    %c0_i32_1 = arith.constant 0 : i32
    return %c0_i32, %c0_i32_0 : i32, i32
  }
  func.func @transform_4(%arg0: i32) -> (i32, i32) {
    %c0_i32 = arith.constant 0 : i32
    %c0_i32_0 = arith.constant 0 : i32
    %c0_i32_1 = arith.constant 0 : i32
    return %c0_i32, %c0_i32_0 : i32, i32
  }
  func.func @transform_5(%arg0: i32) -> (i32, i32) {
    %c0_i32 = arith.constant 0 : i32
    %c0_i32_0 = arith.constant 0 : i32
    return %arg0, %c0_i32 : i32, i32
  }
}

module attributes {stable_mosaic.version = 11 : i64} {
  func.func @_lstm_proj_kernel(%arg0: i32, %arg1: i32, %arg2: memref<16x128xbf16, #tpu.memory_space<vmem>>, %arg3: memref<1x128x512xbf16, #tpu.memory_space<vmem>>, %arg4: memref<1x1x512xf32, #tpu.memory_space<vmem>>, %arg5: memref<1x16x512xf32, #tpu.memory_space<vmem>>) attributes {dimension_semantics = [#tpu.dimension_semantics<parallel>, #tpu.dimension_semantics<parallel>], iteration_bounds = array<i64: 2, 1>, scalar_prefetch = 0 : i64, scratch_operands = 0 : i64, tpu.core_type = #tpu.core_type<tc>, window_params = [{transform_indices = @transform_0, window_bounds = array<i64: 16, 128>}, {transform_indices = @transform_1, window_bounds = array<i64: 1, 128, 512>}, {transform_indices = @transform_2, window_bounds = array<i64: 1, 1, 512>}, {transform_indices = @transform_3, window_bounds = array<i64: 1, 16, 512>}]} {
    %c0 = arith.constant 0 : index
    %c0_0 = arith.constant 0 : index
    %0 = vector.load %arg2[%c0, %c0_0] : memref<16x128xbf16, #tpu.memory_space<vmem>>, vector<16x128xbf16>
    %c0_1 = arith.constant 0 : index
    %c0_2 = arith.constant 0 : index
    %c0_3 = arith.constant 0 : index
    %1 = vector.load %arg3[%c0_1, %c0_2, %c0_3] : memref<1x128x512xbf16, #tpu.memory_space<vmem>>, vector<1x128x512xbf16>
    %2 = vector.shape_cast %1 : vector<1x128x512xbf16> to vector<128x512xbf16>
    %cst = arith.constant dense<0.000000e+00> : vector<16x512xf32>
    %3 = tpu.matmul %0, %2, %cst {dimension_numbers = #tpu.dot_dimension_numbers<[1], [0], [0], [1], [0, 0, 1, 1], [], []>} : vector<16x128xbf16>, vector<128x512xbf16>, vector<16x512xf32> -> vector<16x512xf32>
    %c0_4 = arith.constant 0 : index
    %c0_5 = arith.constant 0 : index
    %c0_6 = arith.constant 0 : index
    %4 = vector.load %arg4[%c0_4, %c0_5, %c0_6] : memref<1x1x512xf32, #tpu.memory_space<vmem>>, vector<1x1x512xf32>
    %5 = vector.shape_cast %4 : vector<1x1x512xf32> to vector<1x512xf32>
    %6 = vector.broadcast %5 : vector<1x512xf32> to vector<16x512xf32>
    %7 = arith.addf %3, %6 : vector<16x512xf32>
    %c0_7 = arith.constant 0 : index
    %c0_8 = arith.constant 0 : index
    %c0_9 = arith.constant 0 : index
    %8 = vector.load %arg5[%c0_7, %c0_8, %c0_9] : memref<1x16x512xf32, #tpu.memory_space<vmem>>, vector<1x16x512xf32>
    %9 = vector.shape_cast %8 : vector<1x16x512xf32> to vector<16x512xf32>
    %10 = vector.shape_cast %7 : vector<16x512xf32> to vector<1x16x512xf32>
    tpu.vector_store %arg5[%c0_7, %c0_8, %c0_9], %10 {strides = array<i32>} : memref<1x16x512xf32, #tpu.memory_space<vmem>>, vector<1x16x512xf32>,
    return
  }
  func.func @transform_0(%arg0: i32, %arg1: i32) -> (i32, i32) {
    %c0_i32 = arith.constant 0 : i32
    %c0_i32_0 = arith.constant 0 : i32
    return %arg1, %c0_i32 : i32, i32
  }
  func.func @transform_1(%arg0: i32, %arg1: i32) -> (i32, i32, i32) {
    %c0_i32 = arith.constant 0 : i32
    %c0_i32_0 = arith.constant 0 : i32
    %c0_i32_1 = arith.constant 0 : i32
    return %arg0, %c0_i32, %c0_i32_0 : i32, i32, i32
  }
  func.func @transform_2(%arg0: i32, %arg1: i32) -> (i32, i32, i32) {
    %c0_i32 = arith.constant 0 : i32
    %c0_i32_0 = arith.constant 0 : i32
    %c0_i32_1 = arith.constant 0 : i32
    return %arg0, %c0_i32, %c0_i32_0 : i32, i32, i32
  }
  func.func @transform_3(%arg0: i32, %arg1: i32) -> (i32, i32, i32) {
    %c0_i32 = arith.constant 0 : i32
    %c0_i32_0 = arith.constant 0 : i32
    return %arg0, %arg1, %c0_i32 : i32, i32, i32
  }
}

module attributes {stable_mosaic.version = 11 : i64} {
  func.func @_lstm_recurrent_kernel(%arg0: i32, %arg1: i32, %arg2: memref<1x1x2x512xf32, #tpu.memory_space<vmem>>, %arg3: memref<1x128x512xbf16, #tpu.memory_space<vmem>>, %arg4: memref<1x2x128xf32, #tpu.memory_space<vmem>>, %arg5: memref<2x128xf32, #tpu.memory_space<vmem>>, %arg6: memref<2x128xf32, #tpu.memory_space<vmem>>) attributes {dimension_semantics = [#tpu.dimension_semantics<parallel>, #tpu.dimension_semantics<arbitrary>], iteration_bounds = array<i64: 2, 8>, scalar_prefetch = 0 : i64, scratch_operands = 2 : i64, tpu.core_type = #tpu.core_type<tc>, window_params = [{transform_indices = @transform_0, window_bounds = array<i64: 1, 1, 2, 512>}, {transform_indices = @transform_1, window_bounds = array<i64: 1, 128, 512>}, {transform_indices = @transform_2, window_bounds = array<i64: 1, 2, 128>}]} {
    %c0_i32 = arith.constant 0 : i32
    %0 = arith.cmpi eq, %arg1, %c0_i32 : i32
    %1 = arith.extui %0 : i1 to i32
    %c0_i32_0 = arith.constant 0 : i32
    %2 = arith.cmpi ne, %1, %c0_i32_0 : i32
    scf.if %2 {
      %cst_21 = arith.constant 0.000000e+00 : f32
      %42 = vector.broadcast %cst_21 : f32 to vector<2x128xf32>
      %c0_22 = arith.constant 0 : index
      %c0_23 = arith.constant 0 : index
      %43 = vector.load %arg5[%c0_22, %c0_23] : memref<2x128xf32, #tpu.memory_space<vmem>>, vector<2x128xf32>
      tpu.vector_store %arg5[%c0_22, %c0_23], %42 {strides = array<i32>} : memref<2x128xf32, #tpu.memory_space<vmem>>, vector<2x128xf32>,
      %cst_24 = arith.constant 0.000000e+00 : f32
      %44 = vector.broadcast %cst_24 : f32 to vector<2x128xf32>
      %c0_25 = arith.constant 0 : index
      %c0_26 = arith.constant 0 : index
      %45 = vector.load %arg6[%c0_25, %c0_26] : memref<2x128xf32, #tpu.memory_space<vmem>>, vector<2x128xf32>
      tpu.vector_store %arg6[%c0_25, %c0_26], %44 {strides = array<i32>} : memref<2x128xf32, #tpu.memory_space<vmem>>, vector<2x128xf32>,
    } else {
    }
    %c0 = arith.constant 0 : index
    %c0_1 = arith.constant 0 : index
    %c0_2 = arith.constant 0 : index
    %c0_3 = arith.constant 0 : index
    %3 = vector.load %arg2[%c0, %c0_1, %c0_2, %c0_3] : memref<1x1x2x512xf32, #tpu.memory_space<vmem>>, vector<1x1x2x512xf32>
    %4 = vector.shape_cast %3 : vector<1x1x2x512xf32> to vector<2x512xf32>
    %c0_4 = arith.constant 0 : index
    %c0_5 = arith.constant 0 : index
    %5 = vector.load %arg5[%c0_4, %c0_5] : memref<2x128xf32, #tpu.memory_space<vmem>>, vector<2x128xf32>
    %6 = arith.truncf %5 : vector<2x128xf32> to vector<2x128xbf16>
    %c0_6 = arith.constant 0 : index
    %c0_7 = arith.constant 0 : index
    %c0_8 = arith.constant 0 : index
    %7 = vector.load %arg3[%c0_6, %c0_7, %c0_8] : memref<1x128x512xbf16, #tpu.memory_space<vmem>>, vector<1x128x512xbf16>
    %8 = vector.shape_cast %7 : vector<1x128x512xbf16> to vector<128x512xbf16>
    %cst = arith.constant dense<0.000000e+00> : vector<2x512xf32>
    %9 = tpu.matmul %6, %8, %cst {dimension_numbers = #tpu.dot_dimension_numbers<[1], [0], [0], [1], [0, 0, 1, 1], [], []>} : vector<2x128xbf16>, vector<128x512xbf16>, vector<2x512xf32> -> vector<2x512xf32>
    %10 = arith.addf %4, %9 : vector<2x512xf32>
    %11 = vector.extract_strided_slice %10 {offsets = [0, 0], sizes = [2, 128], strides = [1, 1]} : vector<2x512xf32> to vector<2x128xf32>
    %12 = arith.negf %11 : vector<2x128xf32>
    %13 = math.exp %12 : vector<2x128xf32>
    %cst_9 = arith.constant 1.000000e+00 : f32
    %14 = vector.broadcast %cst_9 : f32 to vector<2x128xf32>
    %15 = arith.addf %14, %13 : vector<2x128xf32>
    %16 = arith.divf %14, %15 : vector<2x128xf32>
    %17 = vector.extract_strided_slice %10 {offsets = [0, 128], sizes = [2, 128], strides = [1, 1]} : vector<2x512xf32> to vector<2x128xf32>
    %18 = arith.negf %17 : vector<2x128xf32>
    %19 = math.exp %18 : vector<2x128xf32>
    %cst_10 = arith.constant 1.000000e+00 : f32
    %20 = vector.broadcast %cst_10 : f32 to vector<2x128xf32>
    %21 = arith.addf %20, %19 : vector<2x128xf32>
    %22 = arith.divf %20, %21 : vector<2x128xf32>
    %23 = vector.extract_strided_slice %10 {offsets = [0, 256], sizes = [2, 128], strides = [1, 1]} : vector<2x512xf32> to vector<2x128xf32>
    %24 = math.tanh %23 : vector<2x128xf32>
    %25 = vector.extract_strided_slice %10 {offsets = [0, 384], sizes = [2, 128], strides = [1, 1]} : vector<2x512xf32> to vector<2x128xf32>
    %26 = arith.negf %25 : vector<2x128xf32>
    %27 = math.exp %26 : vector<2x128xf32>
    %cst_11 = arith.constant 1.000000e+00 : f32
    %28 = vector.broadcast %cst_11 : f32 to vector<2x128xf32>
    %29 = arith.addf %28, %27 : vector<2x128xf32>
    %30 = arith.divf %28, %29 : vector<2x128xf32>
    %c0_12 = arith.constant 0 : index
    %c0_13 = arith.constant 0 : index
    %31 = vector.load %arg6[%c0_12, %c0_13] : memref<2x128xf32, #tpu.memory_space<vmem>>, vector<2x128xf32>
    %32 = arith.mulf %22, %31 : vector<2x128xf32>
    %33 = arith.mulf %16, %24 : vector<2x128xf32>
    %34 = arith.addf %32, %33 : vector<2x128xf32>
    %35 = math.tanh %34 : vector<2x128xf32>
    %36 = arith.mulf %30, %35 : vector<2x128xf32>
    %c0_14 = arith.constant 0 : index
    %c0_15 = arith.constant 0 : index
    %37 = vector.load %arg6[%c0_14, %c0_15] : memref<2x128xf32, #tpu.memory_space<vmem>>, vector<2x128xf32>
    tpu.vector_store %arg6[%c0_14, %c0_15], %34 {strides = array<i32>} : memref<2x128xf32, #tpu.memory_space<vmem>>, vector<2x128xf32>,
    %c0_16 = arith.constant 0 : index
    %c0_17 = arith.constant 0 : index
    %38 = vector.load %arg5[%c0_16, %c0_17] : memref<2x128xf32, #tpu.memory_space<vmem>>, vector<2x128xf32>
    tpu.vector_store %arg5[%c0_16, %c0_17], %36 {strides = array<i32>} : memref<2x128xf32, #tpu.memory_space<vmem>>, vector<2x128xf32>,
    %c0_18 = arith.constant 0 : index
    %c0_19 = arith.constant 0 : index
    %c0_20 = arith.constant 0 : index
    %39 = vector.load %arg4[%c0_18, %c0_19, %c0_20] : memref<1x2x128xf32, #tpu.memory_space<vmem>>, vector<1x2x128xf32>
    %40 = vector.shape_cast %39 : vector<1x2x128xf32> to vector<2x128xf32>
    %41 = vector.shape_cast %36 : vector<2x128xf32> to vector<1x2x128xf32>
    tpu.vector_store %arg4[%c0_18, %c0_19, %c0_20], %41 {strides = array<i32>} : memref<1x2x128xf32, #tpu.memory_space<vmem>>, vector<1x2x128xf32>,
    return
  }
  func.func @transform_0(%arg0: i32, %arg1: i32) -> (i32, i32, i32, i32) {
    %c2_i32 = arith.constant 2 : i32
    %0 = arith.muli %c2_i32, %arg1 : i32
    %c7_i32 = arith.constant 7 : i32
    %1 = arith.subi %c7_i32, %0 : i32
    %2 = arith.muli %arg0, %1 : i32
    %3 = arith.addi %arg1, %2 : i32
    %c0_i32 = arith.constant 0 : i32
    %c0_i32_0 = arith.constant 0 : i32
    %c0_i32_1 = arith.constant 0 : i32
    return %arg0, %3, %c0_i32, %c0_i32_0 : i32, i32, i32, i32
  }
  func.func @transform_1(%arg0: i32, %arg1: i32) -> (i32, i32, i32) {
    %c0_i32 = arith.constant 0 : i32
    %c0_i32_0 = arith.constant 0 : i32
    %c0_i32_1 = arith.constant 0 : i32
    return %arg0, %c0_i32, %c0_i32_0 : i32, i32, i32
  }
  func.func @transform_2(%arg0: i32, %arg1: i32) -> (i32, i32, i32) {
    %c2_i32 = arith.constant 2 : i32
    %0 = arith.muli %c2_i32, %arg1 : i32
    %c7_i32 = arith.constant 7 : i32
    %1 = arith.subi %c7_i32, %0 : i32
    %2 = arith.muli %arg0, %1 : i32
    %3 = arith.addi %arg1, %2 : i32
    %c0_i32 = arith.constant 0 : i32
    %c0_i32_0 = arith.constant 0 : i32
    return %3, %c0_i32, %arg0 : i32, i32, i32
  }
}

module attributes {stable_mosaic.version = 11 : i64} {
  func.func @_lstm_proj_kernel(%arg0: i32, %arg1: i32, %arg2: memref<16x256xbf16, #tpu.memory_space<vmem>>, %arg3: memref<1x256x512xbf16, #tpu.memory_space<vmem>>, %arg4: memref<1x1x512xf32, #tpu.memory_space<vmem>>, %arg5: memref<1x16x512xf32, #tpu.memory_space<vmem>>) attributes {dimension_semantics = [#tpu.dimension_semantics<parallel>, #tpu.dimension_semantics<parallel>], iteration_bounds = array<i64: 2, 1>, scalar_prefetch = 0 : i64, scratch_operands = 0 : i64, tpu.core_type = #tpu.core_type<tc>, window_params = [{transform_indices = @transform_0, window_bounds = array<i64: 16, 256>}, {transform_indices = @transform_1, window_bounds = array<i64: 1, 256, 512>}, {transform_indices = @transform_2, window_bounds = array<i64: 1, 1, 512>}, {transform_indices = @transform_3, window_bounds = array<i64: 1, 16, 512>}]} {
    %c0 = arith.constant 0 : index
    %c0_0 = arith.constant 0 : index
    %0 = vector.load %arg2[%c0, %c0_0] : memref<16x256xbf16, #tpu.memory_space<vmem>>, vector<16x256xbf16>
    %c0_1 = arith.constant 0 : index
    %c0_2 = arith.constant 0 : index
    %c0_3 = arith.constant 0 : index
    %1 = vector.load %arg3[%c0_1, %c0_2, %c0_3] : memref<1x256x512xbf16, #tpu.memory_space<vmem>>, vector<1x256x512xbf16>
    %2 = vector.shape_cast %1 : vector<1x256x512xbf16> to vector<256x512xbf16>
    %cst = arith.constant dense<0.000000e+00> : vector<16x512xf32>
    %3 = tpu.matmul %0, %2, %cst {dimension_numbers = #tpu.dot_dimension_numbers<[1], [0], [0], [1], [0, 0, 1, 1], [], []>} : vector<16x256xbf16>, vector<256x512xbf16>, vector<16x512xf32> -> vector<16x512xf32>
    %c0_4 = arith.constant 0 : index
    %c0_5 = arith.constant 0 : index
    %c0_6 = arith.constant 0 : index
    %4 = vector.load %arg4[%c0_4, %c0_5, %c0_6] : memref<1x1x512xf32, #tpu.memory_space<vmem>>, vector<1x1x512xf32>
    %5 = vector.shape_cast %4 : vector<1x1x512xf32> to vector<1x512xf32>
    %6 = vector.broadcast %5 : vector<1x512xf32> to vector<16x512xf32>
    %7 = arith.addf %3, %6 : vector<16x512xf32>
    %c0_7 = arith.constant 0 : index
    %c0_8 = arith.constant 0 : index
    %c0_9 = arith.constant 0 : index
    %8 = vector.load %arg5[%c0_7, %c0_8, %c0_9] : memref<1x16x512xf32, #tpu.memory_space<vmem>>, vector<1x16x512xf32>
    %9 = vector.shape_cast %8 : vector<1x16x512xf32> to vector<16x512xf32>
    %10 = vector.shape_cast %7 : vector<16x512xf32> to vector<1x16x512xf32>
    tpu.vector_store %arg5[%c0_7, %c0_8, %c0_9], %10 {strides = array<i32>} : memref<1x16x512xf32, #tpu.memory_space<vmem>>, vector<1x16x512xf32>,
    return
  }
  func.func @transform_0(%arg0: i32, %arg1: i32) -> (i32, i32) {
    %c0_i32 = arith.constant 0 : i32
    %c0_i32_0 = arith.constant 0 : i32
    return %arg1, %c0_i32 : i32, i32
  }
  func.func @transform_1(%arg0: i32, %arg1: i32) -> (i32, i32, i32) {
    %c0_i32 = arith.constant 0 : i32
    %c0_i32_0 = arith.constant 0 : i32
    %c0_i32_1 = arith.constant 0 : i32
    return %arg0, %c0_i32, %c0_i32_0 : i32, i32, i32
  }
  func.func @transform_2(%arg0: i32, %arg1: i32) -> (i32, i32, i32) {
    %c0_i32 = arith.constant 0 : i32
    %c0_i32_0 = arith.constant 0 : i32
    %c0_i32_1 = arith.constant 0 : i32
    return %arg0, %c0_i32, %c0_i32_0 : i32, i32, i32
  }
  func.func @transform_3(%arg0: i32, %arg1: i32) -> (i32, i32, i32) {
    %c0_i32 = arith.constant 0 : i32
    %c0_i32_0 = arith.constant 0 : i32
    return %arg0, %arg1, %c0_i32 : i32, i32, i32
  }
}

module attributes {stable_mosaic.version = 11 : i64} {
  func.func @_out_mlp_kernel(%arg0: memref<2x256xbf16, #tpu.memory_space<vmem>>, %arg1: memref<256x128xbf16, #tpu.memory_space<vmem>>, %arg2: memref<1x128xf32, #tpu.memory_space<vmem>>, %arg3: memref<128x128xbf16, #tpu.memory_space<vmem>>, %arg4: memref<1x128xf32, #tpu.memory_space<vmem>>, %arg5: memref<128x16xbf16, #tpu.memory_space<vmem>>, %arg6: memref<1x16xf32, #tpu.memory_space<vmem>>, %arg7: memref<2x16xf32, #tpu.memory_space<vmem>>) attributes {dimension_semantics = [], scalar_prefetch = 0 : i64, scratch_operands = 0 : i64, tpu.core_type = #tpu.core_type<tc>} {
    %c0 = arith.constant 0 : index
    %c0_0 = arith.constant 0 : index
    %0 = vector.load %arg0[%c0, %c0_0] : memref<2x256xbf16, #tpu.memory_space<vmem>>, vector<2x256xbf16>
    %c0_1 = arith.constant 0 : index
    %c0_2 = arith.constant 0 : index
    %1 = vector.load %arg1[%c0_1, %c0_2] : memref<256x128xbf16, #tpu.memory_space<vmem>>, vector<256x128xbf16>
    %cst = arith.constant dense<0.000000e+00> : vector<2x128xf32>
    %2 = tpu.matmul %0, %1, %cst {dimension_numbers = #tpu.dot_dimension_numbers<[1], [0], [0], [1], [0, 0, 1, 1], [], []>} : vector<2x256xbf16>, vector<256x128xbf16>, vector<2x128xf32> -> vector<2x128xf32>
    %c0_3 = arith.constant 0 : index
    %c0_4 = arith.constant 0 : index
    %3 = vector.load %arg2[%c0_3, %c0_4] : memref<1x128xf32, #tpu.memory_space<vmem>>, vector<1x128xf32>
    %4 = vector.broadcast %3 : vector<1x128xf32> to vector<2x128xf32>
    %5 = arith.addf %2, %4 : vector<2x128xf32>
    %cst_5 = arith.constant 0.000000e+00 : f32
    %6 = vector.broadcast %cst_5 : f32 to vector<2x128xf32>
    %7 = arith.maximumf %5, %6 : vector<2x128xf32>
    %8 = arith.truncf %7 : vector<2x128xf32> to vector<2x128xbf16>
    %c0_6 = arith.constant 0 : index
    %c0_7 = arith.constant 0 : index
    %9 = vector.load %arg3[%c0_6, %c0_7] : memref<128x128xbf16, #tpu.memory_space<vmem>>, vector<128x128xbf16>
    %cst_8 = arith.constant dense<0.000000e+00> : vector<2x128xf32>
    %10 = tpu.matmul %8, %9, %cst_8 {dimension_numbers = #tpu.dot_dimension_numbers<[1], [0], [0], [1], [0, 0, 1, 1], [], []>} : vector<2x128xbf16>, vector<128x128xbf16>, vector<2x128xf32> -> vector<2x128xf32>
    %c0_9 = arith.constant 0 : index
    %c0_10 = arith.constant 0 : index
    %11 = vector.load %arg4[%c0_9, %c0_10] : memref<1x128xf32, #tpu.memory_space<vmem>>, vector<1x128xf32>
    %12 = vector.broadcast %11 : vector<1x128xf32> to vector<2x128xf32>
    %13 = arith.addf %10, %12 : vector<2x128xf32>
    %cst_11 = arith.constant 0.000000e+00 : f32
    %14 = vector.broadcast %cst_11 : f32 to vector<2x128xf32>
    %15 = arith.maximumf %13, %14 : vector<2x128xf32>
    %16 = arith.truncf %15 : vector<2x128xf32> to vector<2x128xbf16>
    %c0_12 = arith.constant 0 : index
    %c0_13 = arith.constant 0 : index
    %17 = vector.load %arg5[%c0_12, %c0_13] : memref<128x16xbf16, #tpu.memory_space<vmem>>, vector<128x16xbf16>
    %cst_14 = arith.constant dense<0.000000e+00> : vector<2x16xf32>
    %18 = tpu.matmul %16, %17, %cst_14 {dimension_numbers = #tpu.dot_dimension_numbers<[1], [0], [0], [1], [0, 0, 1, 1], [], []>} : vector<2x128xbf16>, vector<128x16xbf16>, vector<2x16xf32> -> vector<2x16xf32>
    %c0_15 = arith.constant 0 : index
    %c0_16 = arith.constant 0 : index
    %19 = vector.load %arg6[%c0_15, %c0_16] : memref<1x16xf32, #tpu.memory_space<vmem>>, vector<1x16xf32>
    %20 = vector.broadcast %19 : vector<1x16xf32> to vector<2x16xf32>
    %21 = arith.addf %18, %20 : vector<2x16xf32>
    %c0_17 = arith.constant 0 : index
    %c0_18 = arith.constant 0 : index
    %22 = vector.load %arg7[%c0_17, %c0_18] : memref<2x16xf32, #tpu.memory_space<vmem>>, vector<2x16xf32>
    tpu.vector_store %arg7[%c0_17, %c0_18], %21 {strides = array<i32>} : memref<2x16xf32, #tpu.memory_space<vmem>>, vector<2x16xf32>,
    return
  }
}

</mosaic_0001>

<bundles_post_ra>
// kernel: apcb_forward.7
= control target key start
LH: loop header
LB: loop body
LE: loop exit
PB: predicated region body
PF: predicated region fallthrough
CT: control target
= control target key end

     0   :  { %s1406_s0 = inlined_call_operand.hbm [shape: bf16[16,128], index: 0, kind: input, shape index: {}]   ;;  %s1407_s1 = inlined_call_operand.hbm [shape: bf16[2,128,512], index: 1, kind: input, shape index: {}]   ;;  %s1408_s2 = inlined_call_operand.hbm [shape: f32[2,1,512], index: 2, kind: input, shape index: {}]   ;;  %s1409_s3 = inlined_call_operand.hbm [shape: f32[2,16,512], index: 3, kind: output, shape index: {}]  }
   0x1   :  { %1418 = sst [smem:[#allocation13_spill]] %s1407_s1 }
   0x2   :  { %8 = vsyncpa [#allocation3], 0 }
   0x3   :  { %9 = vsyncpa [#allocation6], 0 }
   0x4   :  { %11 = vsyncpa [#allocation6 + $0x1], 0 }
   0x5   :  { %12 = vsyncpa [#allocation4], 0 }
   0x6   :  { %14 = vsyncpa [#allocation4 + $0x1], 0  ;;  %s1113_s12 = smov 0   ;;  %s1115_s13 = smov 0  }
   0x7   :  { %s1117_s14 = smov 0   ;;  %s1119_s15 = smov 0  }
   0x8   :  { %s1121_s16 = smov 0   ;;  %s1123_s17 = smov 0  }
   0x9 LB: > { %s32_s18 = sadd.s32 1, %s1076_s16  ;;  %s65_s19 = sadd.s32 1, %s1068_s14  ;;  %s1080_s17 = sphi %s1123_s17, %s20_s17   ;;  %s1076_s16 = sphi %s1121_s16, %s1442_s16   ;;  %s1072_s15 = sphi %s1119_s15, %s1441_s15   ;;  %s1068_s14 = sphi %s1117_s14, %s1440_s14   ;;  %s1064_s13 = sphi %s1115_s13, %s1439_s13   ;;  %s1060_s12 = sphi %s1113_s12, %s1438_s12  }
   0xa   : > { %p34_p0 = scmp.ge.s32.totalorder %s32_s18, 2  ;;  %p72_p1 = scmp.ne.s32.totalorder %s1068_s14, %s1064_s13 }
   0xb   : > { %p73_p2 = scmp.eq.s32.totalorder %s1080_s17, 0  ;;  %p798_p5 = scmp.lt.s32.totalorder %s1080_s17, 2 }
   0xc   : > { %s1444_s18 = smov (%p34_p0, %s32_s18), 0  ;;  %s172_s21 = sand.u32 1, %s1080_s17  }
   0xd   : > { %1419 = sst [smem:[#allocation12_spill]] %s1444_s18  ;;  %p74_p4 = por %p73_p2, %p72_p1 }
   0xe   : > { %s62_s20 = ssub.s32 %s1076_s16, %s1444_s18  ;;  %s174_s22 = sand.u32 1, %s1068_s14  }
   0xf   : > { %p63_p6 = scmp.eq.s32.totalorder %s62_s20, 0  ;;  %s769_s23 = sshll.u32 %s1076_s16, 12 }
  0x10   : > { %s720_s25 = sshll.u32 %s174_s22, 8  ;;  %s1420_s1 = sld [smem:[#allocation13_spill]] }
  0x11   : > { %s1161_s24 = scalar_select %p63_p6, %s1068_s14, %s65_s19  }
  0x12   : > { %p1170_p7 = pnand %p798_p5, %p74_p4  ;;  %s176_s30 = scalar_lea.vmem [#allocation5], %s720_s25 }
  0x13   : > { %s183_s4 = sshll.u32 %s176_s30, 4  ;;  %s1176_s5 = scalar_lea.sflag [#allocation6], %s172_s21  ;;  %s1174_s4 = int_to_ptr.vmem [resolvable:$true] %s183_s4 }
  0x14   : > { %s1421_s29 = scalar_select %p1170_p7, 1, 0 }
  0x15   : > { %p1412_p9 = pneg %p1170_p7 }
  0x16   : > { %s1168_s28 = scalar_lea.hbm %s1420_s1, %s769_s23  ;;  %s911_s9 = scalar_lea.hbm %s1420_s1, 8192 }
  0x17   : > { %s906_s6 = scalar_lea.hbm %s1168_s28, 4096  ;;  %p912_p12 = scmp.lt.u32.totalorder %s1168_s28, %s1420_s1 }
  0x18   : > { %p907_p8 = scmp.ne.s32.totalorder %s1168_s28, %s906_s6  ;;  %p913_p13 = scmp.lt.u32.totalorder %s911_s9, %s906_s6 }
  0x19   : > { %p915_p2 = scmp.lt.u32.totalorder %s906_s6, %s1168_s28 }
  0x1a   : > { %p909_p10 = pnand %p1412_p9, %p907_p8  ;;  %p914_p0 = por %p913_p13, %p912_p12 }
  0x1c   : > { %p910_p11 = pneg %p909_p10  ;;  %p916_p4 = por %p915_p2, %p914_p0 }
  0x1e   : > { %p917_p5 = pnand %p916_p4, %p910_p11 }
  0x20   : > { %920 = shalt.err (!%p917_p5)
}
  0x21   : > { %s921_s19 = scalar_lea.vmem %s1174_s4, 4096  ;;  %s1082_s20 = smov [#allocation5]  }
  0x22   : > { %p922_p6 = scmp.ne.s32.totalorder %s1174_s4, %s921_s19  ;;  %s926_s21 = sshll.u32 %s1082_s20, 4  ;;  %s927_s21 = int_to_ptr.vmem [resolvable:$false] %s926_s21 }
  0x23   : > { %s928_s23 = scalar_lea.vmem %s927_s21, 8192  ;;  %p929_p3 = scmp.lt.s32.totalorder %s1174_s4, %s927_s21 }
  0x24   : > { %p924_p8 = pnand %p922_p6, %p1412_p9  ;;  %p930_p12 = scmp.lt.s32.totalorder %s928_s23, %s921_s19 }
  0x26   : > { %p925_p10 = pneg %p924_p8  ;;  %p931_p13 = por %p930_p12, %p929_p3 }
  0x28   : > { %p932_p0 = pnand %p931_p13, %p925_p10 }
  0x2a   : > { %935 = shalt.err (!%p932_p0)
}
  0x2b   : > { %s1083_s25 = smov 256   ;;  %s1084_s26 = smov 16  }
  0x2c   : > { %789 = dma.hbm_to_vmem [thread:$0]  (!%p1170_p7), %s1168_s28, 4096, %s1174_s4, %s1176_s5, %s1083_s25, %s1083_s25, %s1084_s26  }
  0x2d   : > { %s1205_s27 = sadd.s32 4294967295, %s1080_s17   ;;  %s716_s30 = sadd.s32 4294967294, %s1080_s17  }
  0x2e   : > { %p78_p3 = scmp.ne.s32.totalorder %s1064_s13, %s1060_s12  ;;  %p1411_p11 = scmp.eq.s32.totalorder %s1205_s27, 0 }
  0x2f   : > { %p130_p2 = scmp.eq.s32.totalorder %s1205_s27, 1  ;;  %p136_p4 = scmp.eq.s32.totalorder %s716_s30, 1 }
  0x30   : > { %p717_p5 = scmp.ge.s32.totalorder %s1080_s17, 1  ;;  %p1215_p6 = por %p1411_p11, %p78_p3 }
  0x31   : > { %p1222_p8 = por %p130_p2, %p72_p1  ;;  %p1226_p10 = por %p136_p4, %p78_p3 }
  0x32   : > { %s1422_s6 = scalar_select %p1215_p6, 1, 0 }
  0x33   : > { %s1423_s28 = scalar_select %p1222_p8, 1, 0 }
  0x34   : > { %s1424_s4 = scalar_select %p1226_p10, 1, 0 }
  0x35   : > { %p143_p12 = scmp.lt.s32.totalorder %s1080_s17, 3  ;;  %s1085_s8 = smov [#allocation2]  }
  0x36   : > { %s158_s9 = sshll.u32 %s1085_s8, 4  ;;  %s723_s10 = sshll.u32 %s174_s22, 2  ;;  %s1235_s9 = int_to_ptr.vmem [resolvable:$true] %s158_s9 }
  0x37   : > { %p1231_p13 = pnand %p717_p5, %p143_p12  ;;  %s770_s11 = sshll.u32 %s1076_s16, 6 }
  0x38   : > { %s1251_s23 = scalar_lea.hbm %s1408_s2, %s770_s11  ;;  %s197_s25 = scalar_lea.vmem [#allocation7], %s723_s10 }
  0x39   : > { %s1425_s7 = scalar_select %p1231_p13, 1, 0 }
  0x3a   : > { %p782_p0 = pneg %p1231_p13  ;;  %s205_s26 = sshll.u32 %s197_s25, 4  ;;  %s1253_s26 = int_to_ptr.vmem [resolvable:$true] %s205_s26 }
  0x3b   : > { %s936_s22 = scalar_lea.hbm %s1406_s0, 128 }
  0x3c   : > { %p1244_p1 = pnand %p782_p0, %p1411_p11  ;;  %p937_p3 = scmp.ne.s32.totalorder %s1406_s0, %s936_s22 }
  0x3d   : > { %p943_p12 = scmp.lt.u32.totalorder %s936_s22, %s1406_s0 }
  0x3e   : > { %p938_p2 = pneg %p1244_p1 }
  0x40   : > { %p939_p4 = pnand %p938_p2, %p937_p3 }
  0x42   : > { %p940_p5 = pneg %p939_p4 }
  0x44   : > { %p945_p0 = pnand %p943_p12, %p940_p5 }
  0x46   : > { %948 = shalt.err (!%p945_p0)
}
  0x47   : > { %s949_s10 = scalar_lea.vmem %s1235_s9, 128  ;;  %p957_p8 = scmp.lt.s32.totalorder %s1235_s9, %s1235_s9 }
  0x48   : > { %p950_p11 = scmp.ne.s32.totalorder %s1235_s9, %s949_s10  ;;  %p958_p6 = scmp.lt.s32.totalorder %s949_s10, %s949_s10 }
  0x4a   : > { %p952_p9 = pnand %p950_p11, %p938_p2  ;;  %p959_p13 = por %p958_p6, %p957_p8 }
  0x4c   : > { %p953_p10 = pneg %p952_p9 }
  0x4e   : > { %p960_p7 = pnand %p959_p13, %p953_p10 }
  0x50   : > { %963 = shalt.err (!%p960_p7)
}
  0x51   : > { %s1086_s1 = smov 64   ;;  %s1087_s18 = smov 4  }
  0x52   : > { %785 = dma.hbm_to_vmem [thread:$0]  (!%p1244_p1), %s1406_s0, 128, %s1235_s9, [#allocation3], %s1086_s1, %s1086_s1, %s1087_s18  }
  0x53   : > { %s964_s30 = scalar_lea.hbm %s1251_s23, 64  ;;  %p1427_p11 = scmp.ne.s32.totalorder %s1421_s29, 0 }
  0x54   : > { %p965_p9 = scmp.ne.s32.totalorder %s1251_s23, %s964_s30  ;;  %s969_s20 = scalar_lea.hbm %s1408_s2, 128 }
  0x55   : > { %p1428_p6 = pneg %p1427_p11  ;;  %p970_p10 = scmp.lt.u32.totalorder %s1251_s23, %s1408_s2 }
  0x56   : > { %p971_p13 = scmp.lt.u32.totalorder %s969_s20, %s964_s30  ;;  %p973_p2 = scmp.lt.u32.totalorder %s964_s30, %s1251_s23 }
  0x57   : > { %p967_p8 = pnand %p965_p9, %p1428_p6 }
  0x58   : > { %p972_p3 = por %p971_p13, %p970_p10 }
  0x59   : > { %p968_p7 = pneg %p967_p8 }
  0x5a   : > { %p974_p4 = por %p973_p2, %p972_p3 }
  0x5c   : > { %p975_p5 = pnand %p974_p4, %p968_p7 }
  0x5e   : > { %978 = shalt.err (!%p975_p5)
}
  0x5f   : > { %s979_s9 = scalar_lea.vmem %s1253_s26, 64  ;;  %p1429_p12 = pmov %p1428_p6 }
  0x60   : > { %p980_p1 = scmp.ne.s32.totalorder %s1253_s26, %s979_s9  ;;  %s1088_s19 = smov [#allocation7]  }
  0x61   : > { %s984_s1 = sshll.u32 %s1088_s19, 4  ;;  %s985_s1 = int_to_ptr.vmem [resolvable:$false] %s984_s1 }
  0x62   : > { %p982_p0 = pnand %p980_p1, %p1429_p12  ;;  %s986_s18 = scalar_lea.vmem %s985_s1, 128 }
  0x63   : > { %p987_p6 = scmp.lt.s32.totalorder %s1253_s26, %s985_s1  ;;  %p988_p8 = scmp.lt.s32.totalorder %s986_s18, %s979_s9 }
  0x64   : > { %p983_p9 = pneg %p982_p0 }
  0x65   : > { %p989_p10 = por %p988_p8, %p987_p6 }
  0x67   : > { %p990_p13 = pnand %p989_p10, %p983_p9 }
  0x69   : > { %993 = shalt.err (!%p990_p13)
}
  0x6a   : > { %792 = dma.hbm_to_vmem [thread:$0]  (!%p1427_p11), %s1251_s23, 64, %s1253_s26, %s1176_s5  }
  0x6b   : > { %p1430_p7 = scmp.ne.s32.totalorder %s1425_s7, 0 }
  0x6c   : > { %p1431_p3 = scmp.eq.s32.totalorder (!%p1430_p7), %s1205_s27, 0 }
  0x6d   : > { %214 = sbr.rel (%p1430_p7) target bundleno = 388 (0x184), region = 32 }
  0x74   : > { %1047 = dma.done.wait (%p1431_p3), [#allocation3], 128   ;;  %p1432_p2 = pmov %p1431_p3 }
  0x75   : > { %s220_s11 = sand.u32 1, %s1205_s27   ;;  %s1308_s25 = sand.u32 1, %s1064_s13  }
  0x76   : > { %1049 = vsyncadd (%p1432_p2), [#allocation3], 4294967168  ;;  %s728_s29 = sshll.u32 %s1308_s25, 8  ;;  %s221_s30 = scalar_lea.sflag [#allocation6], %s220_s11 }
  0x77   : > { %s1311_s8 = scalar_lea.vmem [#allocation5], %s728_s29  ;;  %p1433_p11 = scmp.ne.s32.totalorder %s1422_s6, 0 }
  0x79   : > { %1051 = dma.done.wait (%p1433_p11), %s221_s30, 4160  }
  0x7a   : > { %1053 = vsyncadd (%p1433_p11), %s221_s30, 4294963136  ;;  %v1089_v0 = vmov 0   ;;  %v857_v1 = vld [vmem:[%s1311_s8 + $0x4] ss:$16 sps:$4 sm:$0xff]   ;;  %v859_v2 = vld [vmem:[%s1311_s8 + $0xc] ss:$16 sps:$4 sm:$0xff]   ;;  %v300_v34 = vlaneseq }
  0x7b   : > { %518 = vmatprep.mubr.bf16.mxu0 %v1089_v0  ;;  %561 = vmatprep.mubr.bf16.mxu1 %v1089_v0  ;;  %v861_v3 = vld [vmem:[%s1311_s8] ss:$16 sps:$4 sm:$0xff]   ;;  %v862_v4 = vld [vmem:[%s1311_s8 + $0x8] ss:$16 sps:$4 sm:$0xff]   ;;  %v863_v5 = vld [vmem:[%s1311_s8 + $0x24] ss:$16 sps:$4 sm:$0xff]  }
  0x7c   : > { %486 = vmatprep.subr.bf16.mxu0 %v857_v1  ;;  %529 = vmatprep.subr.bf16.mxu1 %v859_v2  ;;  %v865_v6 = vld [vmem:[%s1311_s8 + $0x2c] ss:$16 sps:$4 sm:$0xff]   ;;  %v867_v7 = vld [vmem:[%s1311_s8 + $0x20] ss:$16 sps:$4 sm:$0xff]   ;;  %v868_v8 = vld [vmem:[%s1311_s8 + $0x28] ss:$16 sps:$4 sm:$0xff]  }
  0x7d   : > { %487 = vmatpush1.bf16.msra.mxu0 %v861_v3  ;;  %530 = vmatpush1.bf16.msra.mxu1 %v862_v4  ;;  %v869_v9 = vld [vmem:[%s1311_s8 + $0x44] ss:$16 sps:$4 sm:$0xff]   ;;  %v871_v10 = vld [vmem:[%s1311_s8 + $0x4c] ss:$16 sps:$4 sm:$0xff]   ;;  %v873_v11 = vld [vmem:[%s1311_s8 + $0x40] ss:$16 sps:$4 sm:$0xff]  }
  0x7e   : > { %488 = vmatprep.subr.bf16.mxu0 %v863_v5  ;;  %531 = vmatprep.subr.bf16.mxu1 %v865_v6  ;;  %v874_v12 = vld [vmem:[%s1311_s8 + $0x48] ss:$16 sps:$4 sm:$0xff]   ;;  %v875_v13 = vld [vmem:[%s1311_s8 + $0x64] ss:$16 sps:$4 sm:$0xff]   ;;  %v877_v14 = vld [vmem:[%s1311_s8 + $0x6c] ss:$16 sps:$4 sm:$0xff]  }
  0x7f   : > { %v879_v15 = vld [vmem:[%s1311_s8 + $0x60] ss:$16 sps:$4 sm:$0xff]   ;;  %v880_v16 = vld [vmem:[%s1311_s8 + $0x68] ss:$16 sps:$4 sm:$0xff]   ;;  %v881_v17 = vld [vmem:[%s1311_s8 + $0x84] ss:$16 sps:$4 sm:$0xff]  }
  0x80   : > { %v883_v18 = vld [vmem:[%s1311_s8 + $0x8c] ss:$16 sps:$4 sm:$0xff]   ;;  %v885_v19 = vld [vmem:[%s1311_s8 + $0x80] ss:$16 sps:$4 sm:$0xff]   ;;  %v886_v20 = vld [vmem:[%s1311_s8 + $0x88] ss:$16 sps:$4 sm:$0xff]  }
  0x81   : > { %489 = vmatpush1.bf16.msra.mxu0 %v867_v7  ;;  %532 = vmatpush1.bf16.msra.mxu1 %v868_v8  ;;  %v887_v21 = vld [vmem:[%s1311_s8 + $0xa4] ss:$16 sps:$4 sm:$0xff]   ;;  %v889_v22 = vld [vmem:[%s1311_s8 + $0xac] ss:$16 sps:$4 sm:$0xff]   ;;  %v891_v23 = vld [vmem:[%s1311_s8 + $0xa0] ss:$16 sps:$4 sm:$0xff]  }
  0x82   : > { %490 = vmatprep.subr.bf16.mxu0 %v869_v9  ;;  %533 = vmatprep.subr.bf16.mxu1 %v871_v10  ;;  %v892_v24 = vld [vmem:[%s1311_s8 + $0xa8] ss:$16 sps:$4 sm:$0xff]   ;;  %v893_v25 = vld [vmem:[%s1311_s8 + $0xc4] ss:$16 sps:$4 sm:$0xff]   ;;  %v895_v26 = vld [vmem:[%s1311_s8 + $0xcc] ss:$16 sps:$4 sm:$0xff]  }
  0x83   : > { %v897_v27 = vld [vmem:[%s1311_s8 + $0xc0] ss:$16 sps:$4 sm:$0xff]   ;;  %v898_v28 = vld [vmem:[%s1311_s8 + $0xc8] ss:$16 sps:$4 sm:$0xff]   ;;  %v899_v29 = vld [vmem:[%s1311_s8 + $0xe4] ss:$16 sps:$4 sm:$0xff]  }
  0x84   : > { %v901_v30 = vld [vmem:[%s1311_s8 + $0xec] ss:$16 sps:$4 sm:$0xff]   ;;  %v903_v31 = vld [vmem:[%s1311_s8 + $0xe0] ss:$16 sps:$4 sm:$0xff]   ;;  %v904_v32 = vld [vmem:[%s1311_s8 + $0xe8] ss:$16 sps:$4 sm:$0xff]  }
  0x85   : > { %491 = vmatpush1.bf16.msra.mxu0 %v873_v11  ;;  %534 = vmatpush1.bf16.msra.mxu1 %v874_v12  ;;  %v905_v33 = vld [vmem:[#allocation2] sm:$0xff]   ;;  %s729_s5 = sshll.u32 %s1308_s25, 2  ;;  %v301_v35 = vshrl.u32 %v300_v34, 7  ;;  %s730_s6 = sshll.u32 %s1308_s25, 6 }
  0x86   : > { %492 = vmatprep.subr.bf16.mxu0 %v875_v13  ;;  %535 = vmatprep.subr.bf16.mxu1 %v877_v14  ;;  %s233_s27 = scalar_lea.vmem [#allocation7], %s729_s5  ;;  %s260_s7 = scalar_lea.vmem [#allocation8], %s730_s6 }
  0x87   : > { %v302_v36 = vsub.s32 0, %v301_v35  ;;  %v310_v37 = vsub.s32 2, %v301_v35  ;;  %v298_v38 = vld [vmem:[%s233_s27] sm:$0xf]  ;;  %v306_v39 = vsub.s32 1, %v301_v35  ;;  %v314_v40 = vsub.s32 3, %v301_v35 }
  0x88   : > { %s597_s23 = sshll.u32 %s260_s7, 4  ;;  %s771_s26 = sshll.u32 %s1072_s15, 10  ;;  %s1352_s23 = int_to_ptr.vmem [resolvable:$true] %s597_s23 }
  0x89   : > { %493 = vmatpush1.bf16.msra.mxu0 %v879_v15  ;;  %536 = vmatpush1.bf16.msra.mxu1 %v880_v16  ;;  %v303_v41 = vrot.slane %v298_v38, %v302_v36  ;;  %v311_v42 = vrot.slane %v298_v38, %v310_v37  ;;  %v307_v43 = vrot.slane %v298_v38, %v306_v39  ;;  %s1357_s20 = scalar_lea.hbm %s1409_s3, %s771_s26  ;;  %s581_s21 = scalar_lea.sflag [#allocation4], %s1308_s25 }
  0x8a   : > { %494 = vmatprep.subr.bf16.mxu0 %v881_v17  ;;  %537 = vmatprep.subr.bf16.mxu1 %v883_v18  ;;  %v315_v44 = vrot.slane %v298_v38, %v314_v40  ;;  %s994_s10 = scalar_lea.vmem %s1352_s23, 1024  ;;  %p1434_p5 = scmp.ne.s32.totalorder %s1423_s28, 0 }
  0x8b   : > { %p995_p4 = scmp.ne.s32.totalorder %s1352_s23, %s994_s10  ;;  %s1090_s9 = smov [#allocation8]  }
  0x8c   : > { %s998_s19 = sshll.u32 %s1090_s9, 4  ;;  %s999_s19 = int_to_ptr.vmem [resolvable:$false] %s998_s19 }
  0x8d   : > { %495 = vmatpush1.bf16.msra.mxu0 %v885_v19  ;;  %538 = vmatpush1.bf16.msra.mxu1 %v886_v20  ;;  %p996_p1 = pnand %p995_p4, %p1434_p5  ;;  %s1000_s1 = scalar_lea.vmem %s999_s19, 2048 }
  0x8e   : > { %496 = vmatprep.subr.bf16.mxu0 %v887_v21  ;;  %539 = vmatprep.subr.bf16.mxu1 %v889_v22  ;;  %p1001_p0 = scmp.lt.s32.totalorder %s1352_s23, %s999_s19  ;;  %p1002_p9 = scmp.lt.s32.totalorder %s1000_s1, %s994_s10 }
  0x8f   : > { %p997_p12 = pneg %p996_p1 }
  0x90   : > { %p1003_p6 = por %p1002_p9, %p1001_p0 }
  0x91   : > { %497 = vmatpush1.bf16.msra.mxu0 %v891_v23  ;;  %540 = vmatpush1.bf16.msra.mxu1 %v892_v24 }
  0x92   : > { %498 = vmatprep.subr.bf16.mxu0 %v893_v25  ;;  %541 = vmatprep.subr.bf16.mxu1 %v895_v26  ;;  %p1004_p8 = pnand %p1003_p6, %p997_p12 }
  0x95   : > { %499 = vmatpush1.bf16.msra.mxu0 %v897_v27  ;;  %542 = vmatpush1.bf16.msra.mxu1 %v898_v28 }
  0x96   : > { %500 = vmatprep.subr.bf16.mxu0 %v899_v29  ;;  %543 = vmatprep.subr.bf16.mxu1 %v901_v30 }
  0x99   : > { %501 = vmatpush1.bf16.msra.mxu0 %v903_v31  ;;  %544 = vmatpush1.bf16.msra.mxu1 %v904_v32 }
  0x9c   : > { %519 = vmatmul.mubr.bf16.vlgmr.msra.gmra.mrb[0].mxu0 %v905_v33  ;;  %562 = vmatmul.mubr.bf16.vlgmr.msra.gmra.mrb[0].mxu1 %v905_v33 }
 0x16f   : > { %v520_v45 = vpop.f32.mrb[0].mxu0  ;;  %v563_v46 = vpop.f32.mrb[0].mxu1 }
 0x170   : > { %v521_v47 = vadd.f32 %v520_v45, %v303_v41  ;;  %v564_v48 = vadd.f32 %v563_v46, %v311_v42  ;;  %v522_v49 = vpop.f32.mrb[1].mxu0  ;;  %v565_v50 = vpop.f32.mrb[1].mxu1 }
 0x171   : > { %v523_v51 = vadd.f32 %v522_v49, %v307_v43  ;;  %v566_v52 = vadd.f32 %v565_v50, %v315_v44  ;;  %v524_v53 = vpop.f32.mrb[2].mxu0  ;;  %v567_v54 = vpop.f32.mrb[2].mxu1 }
 0x172   : > { %572 = vst [vmem:[%s260_s7] sm:$0xff] %v521_v47  ;;  %574 = vst [vmem:[%s260_s7 + $0x10] sm:$0xff] %v564_v48  ;;  %v525_v55 = vadd.f32 %v524_v53, %v303_v41  ;;  %v568_v56 = vadd.f32 %v567_v54, %v311_v42  ;;  %v526_v57 = vpop.f32.mrb[3].mxu0  ;;  %v569_v58 = vpop.f32.mrb[3].mxu1 }
 0x173   : > { %573 = vst [vmem:[%s260_s7 + $0x8] sm:$0xff] %v523_v51  ;;  %575 = vst [vmem:[%s260_s7 + $0x18] sm:$0xff] %v566_v52  ;;  %v527_v59 = vadd.f32 %v526_v57, %v307_v43  ;;  %v570_v60 = vadd.f32 %v569_v58, %v315_v44 }
 0x174   : > { %576 = vst [vmem:[%s260_s7 + $0x20] sm:$0xff] %v525_v55  ;;  %578 = vst [vmem:[%s260_s7 + $0x30] sm:$0xff] %v568_v56 }
 0x175   : > { %577 = vst [vmem:[%s260_s7 + $0x28] sm:$0xff] %v527_v59  ;;  %579 = vst [vmem:[%s260_s7 + $0x38] sm:$0xff] %v570_v60 }
 0x176   : > { %1007 = shalt.err (!%p1004_p8)
}
 0x177   : > { %s1008_s18 = scalar_lea.hbm %s1357_s20, 1024  ;;  %s1012_s30 = scalar_lea.hbm %s1409_s3, 2048 }
 0x178   : > { %p1009_p10 = scmp.ne.s32.totalorder %s1357_s20, %s1008_s18  ;;  %p1013_p3 = scmp.lt.u32.totalorder %s1357_s20, %s1409_s3 }
 0x179   : > { %p1014_p2 = scmp.lt.u32.totalorder %s1012_s30, %s1008_s18  ;;  %p1016_p4 = scmp.lt.u32.totalorder %s1008_s18, %s1357_s20 }
 0x17a   : > { %p1010_p13 = pnand %p1009_p10, %p1434_p5 }
 0x17b   : > { %p1015_p11 = por %p1014_p2, %p1013_p3 }
 0x17c   : > { %p1011_p7 = pneg %p1010_p13 }
 0x17d   : > { %p1017_p1 = por %p1016_p4, %p1015_p11 }
 0x17f   : > { %p1018_p12 = pnand %p1017_p1, %p1011_p7 }
 0x181   : > { %1021 = shalt.err (!%p1018_p12)
}
 0x182   : > { %s1091_s27 = smov 512   ;;  %s1092_s6 = smov 32  }
 0x183   : > { %780 = dma.vmem_to_hbm [thread:$0]  (%p1434_p5), %s1352_s23, 1024, %s1357_s20, %s581_s21, %s1091_s27, %s1091_s27, %s1092_s6  }
 0x184 PF: > { %s612_s7 = sand.u32 1, %s1060_s12   ;;  %p1435_p0 = scmp.ne.s32.totalorder %s1424_s4, 0 }
 0x185   : > { %p1436_p9 = scmp.ge.s32.totalorder %s1080_s17, 2  ;;  %s613_s26 = scalar_lea.sflag [#allocation4], %s612_s7 }
 0x187   : > { %p794_p6 = pnand %p1436_p9, %p1435_p0 }
 0x189   : > { %1055 = dma.done.wait (!%p794_p6), %s613_s26, 1024  }
 0x18a   : > { %1057 = vsyncadd (!%p794_p6), %s613_s26, 4294966272  ;;  %s20_s17 = sadd.s32 1, %s1080_s17   ;;  %s1437_s28 = sld [smem:[#allocation12_spill]] }
 0x18b   : > { %p17_p8 = scmp.ge.s32.totalorder %s20_s17, 4   ;;  %s1438_s12 = smov %s1064_s13 }
 0x18c   : > { %s1439_s13 = smov %s1068_s14  ;;  %s1440_s14 = smov %s1161_s24 }
 0x18d   : > { %s1441_s15 = smov %s1076_s16  ;;  %19 = sbr.rel (!%p17_p8) target bundleno = 9 (0x9), region = 94 }
 0x190   : > { %s1442_s16 = smov %s1437_s28 }
 0x194   :  { %618 = vsyncpa [#allocation3], 1 }
 0x195   :  { %620 = vsyncpa [#allocation3 + $0x1], 1 }
 0x196   :  { %621 = vsyncpa [#allocation6], 1 }
 0x197   :  { %623 = vsyncpa [#allocation6 + $0x1], 1 }
 0x198   :  { %624 = vsyncpa [#allocation4], 1 }
 0x199   :  { %626 = vsyncpa [#allocation4 + $0x1], 1 }

// kernel: apcb_forward.6
= control target key start
LH: loop header
LB: loop body
LE: loop exit
PB: predicated region body
PF: predicated region fallthrough
CT: control target
= control target key end

     0   :  { %10 = vsyncpa [#allocation3], 0  ;;  %s966_s0 = inlined_call_operand.hbm [shape: bf16[16,256], index: 0, kind: input, shape index: {}]   ;;  %s967_s1 = inlined_call_operand.hbm [shape: bf16[256,256], index: 1, kind: input, shape index: {}]   ;;  %s968_s2 = inlined_call_operand.hbm [shape: f32[1,256], index: 2, kind: input, shape index: {}]   ;;  %s969_s3 = inlined_call_operand.hbm [shape: bf16[256,128], index: 3, kind: input, shape index: {}]   ;;  %s970_s4 = inlined_call_operand.hbm [shape: f32[1,128], index: 4, kind: input, shape index: {}]   ;;  %s971_s5 = inlined_call_operand.hbm [shape: f32[16,128], index: 5, kind: output, shape index: {}]  }
   0x1   :  { %11 = vsyncpa [#allocation6], 0 }
   0x2   :  { %12 = vsyncpa [#allocation9], 0 }
   0x3   :  { %13 = vsyncpa [#allocation4], 0  ;;  %s838_s18 = smov [#allocation5]   ;;  %s839_s20 = smov [#allocation8]  }
   0x4   :  { %s31_s19 = sshll.u32 %s838_s18, 4  ;;  %s53_s21 = sshll.u32 %s839_s20, 4  ;;  %s32_s19 = int_to_ptr.vmem [resolvable:$true] %s31_s19  ;;  %s878_s21 = int_to_ptr.vmem [resolvable:$true] %s53_s21 }
   0x5   :  { %s698_s24 = scalar_lea.hbm %s967_s1, 4096 }
   0x6   :  { %p699_p0 = scmp.ne.s32.totalorder %s967_s1, %s698_s24  ;;  %p702_p1 = scmp.lt.u32.totalorder %s698_s24, %s967_s1 }
   0x8   :  { %p704_p2 = pnand %p702_p1, %p699_p0 }
   0xa   :  { %707 = shalt.err (!%p704_p2)
}
   0xb   :  { %s708_s29 = scalar_lea.vmem %s32_s19, 4096  ;;  %p713_p4 = scmp.lt.s32.totalorder %s32_s19, %s32_s19 }
   0xc   :  { %p709_p3 = scmp.ne.s32.totalorder %s32_s19, %s708_s29  ;;  %p714_p5 = scmp.lt.s32.totalorder %s708_s29, %s708_s29 }
   0xe   :  { %p715_p6 = por %p714_p5, %p713_p4 }
  0x10   :  { %p716_p7 = pnand %p715_p6, %p709_p3 }
  0x12   :  { %719 = shalt.err (!%p716_p7)
}
  0x13   :  { %s840_s30 = smov 128   ;;  %s841_s6 = smov 8  }
  0x14   :  { %37 = dma.hbm_to_vmem [thread:$0]  %s967_s1, 4096, %s32_s19, [#allocation6], %s840_s30, %s840_s30, %s841_s6  }
  0x15   :  { %s720_s11 = scalar_lea.hbm %s969_s3, 2048 }
  0x16   :  { %p721_p8 = scmp.ne.s32.totalorder %s969_s3, %s720_s11  ;;  %p724_p9 = scmp.lt.u32.totalorder %s720_s11, %s969_s3 }
  0x18   :  { %p726_p10 = pnand %p724_p9, %p721_p8 }
  0x1a   :  { %729 = shalt.err (!%p726_p10)
}
  0x1b   :  { %s730_s16 = scalar_lea.vmem %s878_s21, 2048  ;;  %p735_p12 = scmp.lt.s32.totalorder %s878_s21, %s878_s21 }
  0x1c   :  { %p731_p11 = scmp.ne.s32.totalorder %s878_s21, %s730_s16  ;;  %p736_p13 = scmp.lt.s32.totalorder %s730_s16, %s730_s16 }
  0x1e   :  { %p737_p0 = por %p736_p13, %p735_p12 }
  0x20   :  { %p738_p1 = pnand %p737_p0, %p731_p11 }
  0x22   :  { %741 = shalt.err (!%p738_p1)
}
  0x23   :  { %s842_s1 = smov 64   ;;  %s843_s17 = smov 4  }
  0x24   :  { %59 = dma.hbm_to_vmem [thread:$0]  %s969_s3, 2048, %s878_s21, [#allocation9], %s842_s1, %s842_s1, %s843_s17  }
  0x25   :  { %s844_s20 = smov [#allocation2]   ;;  %s845_s23 = smov [#allocation7]  }
  0x26   :  { %s19_s22 = sshll.u32 %s844_s20, 4  ;;  %s44_s24 = sshll.u32 %s845_s23, 4  ;;  %s20_s22 = int_to_ptr.vmem [resolvable:$true] %s19_s22  ;;  %s45_s24 = int_to_ptr.vmem [resolvable:$true] %s44_s24 }
  0x27   :  { %s742_s27 = scalar_lea.hbm %s966_s0, 256 }
  0x28   :  { %p743_p2 = scmp.ne.s32.totalorder %s966_s0, %s742_s27  ;;  %p746_p3 = scmp.lt.u32.totalorder %s742_s27, %s966_s0 }
  0x2a   :  { %p748_p4 = pnand %p746_p3, %p743_p2 }
  0x2c   :  { %751 = shalt.err (!%p748_p4)
}
  0x2d   :  { %s752_s3 = scalar_lea.vmem %s20_s22, 256  ;;  %p757_p6 = scmp.lt.s32.totalorder %s20_s22, %s20_s22 }
  0x2e   :  { %p753_p5 = scmp.ne.s32.totalorder %s20_s22, %s752_s3  ;;  %p758_p7 = scmp.lt.s32.totalorder %s752_s3, %s752_s3 }
  0x30   :  { %p759_p8 = por %p758_p7, %p757_p6 }
  0x32   :  { %p760_p9 = pnand %p759_p8, %p753_p5 }
  0x34   :  { %763 = shalt.err (!%p760_p9)
}
  0x35   :  { %25 = dma.hbm_to_vmem [thread:$0]  %s966_s0, 256, %s20_s22, [#allocation3], %s840_s30, %s840_s30, %s841_s6  }
  0x36   :  { %s764_s12 = scalar_lea.hbm %s968_s2, 32 }
  0x37   :  { %p765_p10 = scmp.ne.s32.totalorder %s968_s2, %s764_s12  ;;  %p768_p11 = scmp.lt.u32.totalorder %s764_s12, %s968_s2 }
  0x39   :  { %p770_p12 = pnand %p768_p11, %p765_p10 }
  0x3b   :  { %773 = shalt.err (!%p770_p12)
}
  0x3c   :  { %s774_s1 = scalar_lea.vmem %s45_s24, 32  ;;  %p779_p0 = scmp.lt.s32.totalorder %s45_s24, %s45_s24 }
  0x3d   :  { %p775_p13 = scmp.ne.s32.totalorder %s45_s24, %s774_s1  ;;  %p780_p1 = scmp.lt.s32.totalorder %s774_s1, %s774_s1 }
  0x3f   :  { %p781_p2 = por %p780_p1, %p779_p0 }
  0x41   :  { %p782_p3 = pnand %p781_p2, %p775_p13 }
  0x43   :  { %785 = shalt.err (!%p782_p3)
}
  0x44   :  { %47 = dma.hbm_to_vmem [thread:$0]  %s968_s2, 32, %s45_s24, [#allocation6]  }
  0x45   :  { %s846_s18 = smov [#allocation10]   ;;  %s786_s23 = scalar_lea.hbm %s970_s4, 16 }
  0x46   :  { %s66_s19 = sshll.u32 %s846_s18, 4  ;;  %p787_p4 = scmp.ne.s32.totalorder %s970_s4, %s786_s23  ;;  %s67_s19 = int_to_ptr.vmem [resolvable:$true] %s66_s19 }
  0x47   :  { %p790_p5 = scmp.lt.u32.totalorder %s786_s23, %s970_s4 }
  0x49   :  { %p792_p6 = pnand %p790_p5, %p787_p4 }
  0x4b   :  { %795 = shalt.err (!%p792_p6)
}
  0x4c   :  { %s796_s29 = scalar_lea.vmem %s67_s19, 16  ;;  %s800_s2 = scalar_lea.vmem %s67_s19, 32 }
  0x4d   :  { %p797_p7 = scmp.ne.s32.totalorder %s67_s19, %s796_s29  ;;  %p801_p8 = scmp.lt.s32.totalorder %s67_s19, %s67_s19 }
  0x4e   :  { %p802_p9 = scmp.lt.s32.totalorder %s800_s2, %s796_s29 }
  0x50   :  { %p803_p10 = por %p802_p9, %p801_p8 }
  0x52   :  { %p804_p11 = pnand %p803_p10, %p797_p7 }
  0x54   :  { %807 = shalt.err (!%p804_p11)
}
  0x55   :  { %69 = dma.hbm_to_vmem [thread:$0]  %s970_s4, 16, %s67_s19, [#allocation9]  }
  0x56   :  { %830 = dma.done.wait [#allocation3], 256  }
  0x57   :  { %831 = vsyncadd [#allocation3], 4294967040 }
  0x58   :  { %832 = dma.done.wait [#allocation6], 4128  }
  0x59   :  { %833 = vsyncadd [#allocation6], 4294963168 }
  0x5a   :  { %834 = dma.done.wait [#allocation9], 2064  }
  0x5b   :  { %835 = vsyncadd [#allocation9], 4294965232  ;;  %v631_v0 = vld [vmem:[#allocation5 + $0x4] ss:$8 sps:$4 sm:$0xff]   ;;  %v633_v1 = vld [vmem:[#allocation5] ss:$8 sps:$4 sm:$0xff]   ;;  %v122_v50 = vlaneseq }
  0x5c   :  { %302 = vmatprep.subr.bf16.mxu0 %v631_v0  ;;  %v634_v2 = vld [vmem:[#allocation5 + $0x14] ss:$8 sps:$4 sm:$0xff]   ;;  %v636_v3 = vld [vmem:[#allocation5 + $0x10] ss:$8 sps:$4 sm:$0xff]   ;;  %v637_v4 = vld [vmem:[#allocation5 + $0x24] ss:$8 sps:$4 sm:$0xff]  }
  0x5d   :  { %303 = vmatpush1.bf16.msra.mxu0 %v633_v1  ;;  %v639_v5 = vld [vmem:[#allocation5 + $0x20] ss:$8 sps:$4 sm:$0xff]   ;;  %v640_v6 = vld [vmem:[#allocation5 + $0x34] ss:$8 sps:$4 sm:$0xff]   ;;  %v642_v7 = vld [vmem:[#allocation5 + $0x30] ss:$8 sps:$4 sm:$0xff]  }
  0x5e   :  { %304 = vmatprep.subr.bf16.mxu0 %v634_v2  ;;  %v643_v8 = vld [vmem:[#allocation5 + $0x44] ss:$8 sps:$4 sm:$0xff]   ;;  %v645_v9 = vld [vmem:[#allocation5 + $0x40] ss:$8 sps:$4 sm:$0xff]   ;;  %v646_v10 = vld [vmem:[#allocation5 + $0x54] ss:$8 sps:$4 sm:$0xff]  }
  0x5f   :  { %v648_v11 = vld [vmem:[#allocation5 + $0x50] ss:$8 sps:$4 sm:$0xff]   ;;  %v649_v12 = vld [vmem:[#allocation5 + $0x64] ss:$8 sps:$4 sm:$0xff]   ;;  %v651_v13 = vld [vmem:[#allocation5 + $0x60] ss:$8 sps:$4 sm:$0xff]  }
  0x60   :  { %v652_v14 = vld [vmem:[#allocation5 + $0x74] ss:$8 sps:$4 sm:$0xff]   ;;  %v682_v16 = vld [vmem:[#allocation8 + $0x40] sm:$0xff]   ;;  %v654_v18 = vld [vmem:[#allocation5 + $0x70] ss:$8 sps:$4 sm:$0xff]   ;;  %v123_v51 = vshrl.u32 %v122_v50, 7 }
  0x61   :  { %305 = vmatpush1.bf16.msra.mxu0 %v636_v3  ;;  %v681_v15 = vld [vmem:[#allocation2 + $0x4] ss:$8 sps:$4 sm:$0xff]   ;;  %v683_v17 = vld [vmem:[#allocation8] sm:$0xff]   ;;  %599 = vmatprep.subr.bf16.mxu1 %v682_v16  ;;  %v684_v19 = vld [vmem:[#allocation8 + $0x48] sm:$0xff]   ;;  %s847_s4 = smov [#allocation11]  }
  0x62   :  { %306 = vmatprep.subr.bf16.mxu0 %v637_v4  ;;  %334 = vmatprep.mubr.bf16.mxu0 %v681_v15  ;;  %v685_v20 = vld [vmem:[#allocation8 + $0x8] sm:$0xff]   ;;  %v686_v21 = vld [vmem:[#allocation8 + $0x50] sm:$0xff]   ;;  %v688_v25 = vld [vmem:[#allocation8 + $0x58] sm:$0xff]   ;;  %v124_v52 = vsub.s32 0, %v123_v51  ;;  %v128_v54 = vsub.s32 1, %v123_v51  ;;  %s534_s8 = sshll.u32 %s847_s4, 4  ;;  %s535_s8 = int_to_ptr.vmem [resolvable:$true] %s534_s8 }
  0x63   :  { %600 = vmatpush3.bf16.msra.mxu1 %v683_v17  ;;  %v655_v22 = vld [vmem:[#allocation5 + $0x84] ss:$8 sps:$4 sm:$0xff]   ;;  %v657_v23 = vld [vmem:[#allocation5 + $0x80] ss:$8 sps:$4 sm:$0xff]   ;;  %v687_v24 = vld [vmem:[#allocation8 + $0x10] sm:$0xff]   ;;  %s808_s3 = scalar_lea.vmem %s535_s8, 256  ;;  %p813_p13 = scmp.lt.s32.totalorder %s535_s8, %s535_s8 }
  0x64   :  { %601 = vmatprep.subr.bf16.mxu1 %v684_v19  ;;  %v658_v26 = vld [vmem:[#allocation5 + $0x94] ss:$8 sps:$4 sm:$0xff]   ;;  %v660_v27 = vld [vmem:[#allocation5 + $0x90] ss:$8 sps:$4 sm:$0xff]   ;;  %v690_v29 = vld [vmem:[#allocation8 + $0x60] sm:$0xff]   ;;  %p809_p12 = scmp.ne.s32.totalorder %s535_s8, %s808_s3  ;;  %p814_p0 = scmp.lt.s32.totalorder %s808_s3, %s808_s3 }
  0x65   :  { %307 = vmatpush1.bf16.msra.mxu0 %v639_v5  ;;  %v689_v28 = vld [vmem:[#allocation8 + $0x18] sm:$0xff]   ;;  %v661_v30 = vld [vmem:[#allocation5 + $0xa4] ss:$8 sps:$4 sm:$0xff]   ;;  %v694_v46 = vld [vmem:[#allocation8 + $0x70] sm:$0xff]  }
  0x66   :  { %308 = vmatprep.subr.bf16.mxu0 %v640_v6  ;;  %v691_v31 = vld [vmem:[#allocation8 + $0x20] sm:$0xff]   ;;  %v692_v33 = vld [vmem:[#allocation8 + $0x68] sm:$0xff]   ;;  %v664_v34 = vld [vmem:[#allocation5 + $0xb4] ss:$8 sps:$4 sm:$0xff]   ;;  %p815_p1 = por %p814_p0, %p813_p13 }
  0x67   :  { %602 = vmatpush3.bf16.msra.mxu1 %v685_v20  ;;  %v663_v32 = vld [vmem:[#allocation5 + $0xa0] ss:$8 sps:$4 sm:$0xff]   ;;  %v666_v35 = vld [vmem:[#allocation5 + $0xb0] ss:$8 sps:$4 sm:$0xff]   ;;  %v667_v36 = vld [vmem:[#allocation5 + $0xc4] ss:$8 sps:$4 sm:$0xff]  }
  0x68   :  { %603 = vmatprep.subr.bf16.mxu1 %v686_v21  ;;  %v669_v37 = vld [vmem:[#allocation5 + $0xc0] ss:$8 sps:$4 sm:$0xff]   ;;  %v670_v38 = vld [vmem:[#allocation5 + $0xd4] ss:$8 sps:$4 sm:$0xff]   ;;  %v672_v39 = vld [vmem:[#allocation5 + $0xd0] ss:$8 sps:$4 sm:$0xff]   ;;  %p816_p2 = pnand %p815_p1, %p809_p12 }
  0x69   :  { %309 = vmatpush1.bf16.msra.mxu0 %v642_v7  ;;  %v673_v40 = vld [vmem:[#allocation5 + $0xe4] ss:$8 sps:$4 sm:$0xff]   ;;  %v675_v41 = vld [vmem:[#allocation5 + $0xe0] ss:$8 sps:$4 sm:$0xff]   ;;  %v676_v42 = vld [vmem:[#allocation5 + $0xf4] ss:$8 sps:$4 sm:$0xff]  }
  0x6a   :  { %310 = vmatprep.subr.bf16.mxu0 %v643_v8  ;;  %v678_v43 = vld [vmem:[#allocation5 + $0xf0] ss:$8 sps:$4 sm:$0xff]   ;;  %v120_v53 = vld [vmem:[#allocation7] sm:$0x3]  ;;  %v582_v8 = vld [vmem:[#allocation10] ss:$0 sm:$0xff] }
  0x6b   :  { %604 = vmatpush3.bf16.msra.mxu1 %v687_v24  ;;  %v679_v44 = vld [vmem:[#allocation2] ss:$8 sps:$4 sm:$0xff]   ;;  %v125_v55 = vrot.slane %v120_v53, %v124_v52  ;;  %v129_v56 = vrot.slane %v120_v53, %v128_v54 }
  0x6c   :  { %605 = vmatprep.subr.bf16.mxu1 %v688_v25  ;;  %v693_v45 = vld [vmem:[#allocation8 + $0x28] sm:$0xff]   ;;  %v695_v47 = vld [vmem:[#allocation8 + $0x30] sm:$0xff]   ;;  %v696_v48 = vld [vmem:[#allocation8 + $0x78] sm:$0xff]  }
  0x6d   :  { %311 = vmatpush1.bf16.msra.mxu0 %v645_v9  ;;  %v697_v49 = vld [vmem:[#allocation8 + $0x38] sm:$0xff]  }
  0x6e   :  { %312 = vmatprep.subr.bf16.mxu0 %v646_v10 }
  0x6f   :  { %606 = vmatpush3.bf16.msra.mxu1 %v689_v28 }
  0x70   :  { %607 = vmatprep.subr.bf16.mxu1 %v690_v29 }
  0x71   :  { %313 = vmatpush1.bf16.msra.mxu0 %v648_v11 }
  0x72   :  { %314 = vmatprep.subr.bf16.mxu0 %v649_v12 }
  0x73   :  { %608 = vmatpush3.bf16.msra.mxu1 %v691_v31 }
  0x74   :  { %609 = vmatprep.subr.bf16.mxu1 %v692_v33 }
  0x75   :  { %315 = vmatpush1.bf16.msra.mxu0 %v651_v13 }
  0x76   :  { %316 = vmatprep.subr.bf16.mxu0 %v652_v14 }
  0x77   :  { %610 = vmatpush3.bf16.msra.mxu1 %v693_v45 }
  0x78   :  { %611 = vmatprep.subr.bf16.mxu1 %v694_v46 }
  0x79   :  { %317 = vmatpush1.bf16.msra.mxu0 %v654_v18 }
  0x7a   :  { %318 = vmatprep.subr.bf16.mxu0 %v655_v22 }
  0x7b   :  { %612 = vmatpush3.bf16.msra.mxu1 %v695_v47 }
  0x7c   :  { %613 = vmatprep.subr.bf16.mxu1 %v696_v48 }
  0x7d   :  { %319 = vmatpush1.bf16.msra.mxu0 %v657_v23 }
  0x7e   :  { %320 = vmatprep.subr.bf16.mxu0 %v658_v26 }
  0x7f   :  { %614 = vmatpush3.bf16.msra.mxu1 %v697_v49 }
  0x81   :  { %321 = vmatpush1.bf16.msra.mxu0 %v660_v27 }
  0x82   :  { %322 = vmatprep.subr.bf16.mxu0 %v661_v30 }
  0x85   :  { %323 = vmatpush1.bf16.msra.mxu0 %v663_v32 }
  0x86   :  { %324 = vmatprep.subr.bf16.mxu0 %v664_v34 }
  0x89   :  { %325 = vmatpush1.bf16.msra.mxu0 %v666_v35 }
  0x8a   :  { %326 = vmatprep.subr.bf16.mxu0 %v667_v36 }
  0x8d   :  { %327 = vmatpush1.bf16.msra.mxu0 %v669_v37 }
  0x8e   :  { %328 = vmatprep.subr.bf16.mxu0 %v670_v38 }
  0x91   :  { %329 = vmatpush1.bf16.msra.mxu0 %v672_v39 }
  0x92   :  { %330 = vmatprep.subr.bf16.mxu0 %v673_v40 }
  0x95   :  { %331 = vmatpush1.bf16.msra.mxu0 %v675_v41 }
  0x96   :  { %332 = vmatprep.subr.bf16.mxu0 %v676_v42 }
  0x99   :  { %333 = vmatpush1.bf16.msra.mxu0 %v678_v43 }
  0x9c   :  { %335 = vmatmul.mubr.bf16.vlgmr.msra.gmra.mrb[0].mxu0 %v679_v44 }
 0x16f   :  { %v336_v57 = vpop.f32.mrb[0].mxu0 }
 0x170   :  { %v337_v58 = vadd.f32 %v336_v57, %v125_v55  ;;  %v338_v59 = vpop.f32.mrb[1].mxu0 }
 0x171   :  { %v339_v60 = vadd.f32 %v338_v59, %v129_v56  ;;  %v340_v61 = vpop.f32.mrb[2].mxu0 }
 0x172   :  { %v341_v62 = vadd.f32 %v340_v61, %v125_v55  ;;  %v342_v63 = vpop.f32.mrb[3].mxu0  ;;  %v345_v1 = vmax.f32 %v337_v58, 0.0 }
 0x173   :  { %v343_v0 = vadd.f32 %v342_v63, %v129_v56  ;;  %v346_v3 = vmax.f32 %v339_v60, 0.0 }
 0x174   :  { %v347_v2 = vmax.f32 %v341_v62, 0.0 }
 0x175   :  { %v348_v4 = vmax.f32 %v343_v0, 0.0 }
 0x176   :  { %v349_v5 = vpack.c.bf16 %v347_v2, %v345_v1 }
 0x177   :  { %v350_v6 = vpack.c.bf16 %v348_v4, %v346_v3 }
 0x179   :  { %518 = vmatprep.mubr.bf16.mxu1 %v350_v6 }
 0x17a   :  { %519 = vmatmul.mubr.bf16.vlgmr.msra.gmra.mrb[0].mxu1 %v349_v5 }
 0x24d   :  { %v615_v7 = vpop.f32.mrb[0].mxu1 }
 0x24e   :  { %v616_v9 = vpop.f32.mrb[1].mxu1 }
 0x24f   :  { %v617_v10 = vadd.f32 %v616_v9, %v615_v7  ;;  %v618_v11 = vpop.f32.mrb[2].mxu1 }
 0x250   :  { %v619_v12 = vpop.f32.mrb[3].mxu1 }
 0x251   :  { %v521_v13 = vadd.f32 %v617_v10, %v582_v8  ;;  %v620_v14 = vadd.f32 %v619_v12, %v618_v11 }
 0x253   :  { %527 = vst [vmem:[#allocation11] sm:$0xff] %v521_v13  ;;  %v524_v15 = vadd.f32 %v620_v14, %v582_v8 }
 0x255   :  { %528 = vst [vmem:[#allocation11 + $0x8] sm:$0xff] %v524_v15 }
 0x256   :  { %819 = shalt.err (!%p816_p2)
}
 0x257   :  { %s820_s10 = scalar_lea.hbm %s971_s5, 256 }
 0x258   :  { %p821_p3 = scmp.ne.s32.totalorder %s971_s5, %s820_s10  ;;  %p824_p4 = scmp.lt.u32.totalorder %s820_s10, %s971_s5 }
 0x25a   :  { %p826_p5 = pnand %p824_p4, %p821_p3 }
 0x25c   :  { %829 = shalt.err (!%p826_p5)
}
 0x25d   :  { %540 = dma.vmem_to_hbm [thread:$0]  %s535_s8, 256, %s971_s5, [#allocation4], %s840_s30, %s840_s30, %s841_s6  }
 0x25e   :  { %836 = dma.done.wait [#allocation4], 256  }
 0x25f   :  { %837 = vsyncadd [#allocation4], 4294967040 }
 0x260   :  { %544 = vsyncpa [#allocation3], 1 }
 0x261   :  { %545 = vsyncpa [#allocation6], 1 }
 0x262   :  { %546 = vsyncpa [#allocation9], 1 }
 0x263   :  { %547 = vsyncpa [#allocation4], 1 }

// kernel: apcb_forward.8
= control target key start
LH: loop header
LB: loop body
LE: loop exit
PB: predicated region body
PF: predicated region fallthrough
CT: control target
= control target key end

     0   :  { %7 = vsyncpa [#allocation5], 0  ;;  %s1537_s0 = inlined_call_operand.hbm [shape: f32[2,8,2,512], index: 0, kind: input, shape index: {}]   ;;  %s1538_s1 = inlined_call_operand.hbm [shape: bf16[2,128,512], index: 1, kind: input, shape index: {}]   ;;  %s1539_s2 = inlined_call_operand.hbm [shape: f32[8,2,256], index: 2, kind: output, shape index: {}]  }
   0x1   :  { %9 = vsyncpa [#allocation5 + $0x1], 0 }
   0x2   :  { %10 = vsyncpa [#allocation8], 0 }
   0x3   :  { %12 = vsyncpa [#allocation8 + $0x1], 0 }
   0x4   :  { %13 = vsyncpa [#allocation6], 0 }
   0x5   :  { %15 = vsyncpa [#allocation6 + $0x1], 0  ;;  %s1169_s9 = smov 0   ;;  %s1171_s10 = smov 0  }
   0x6   :  { %s1173_s11 = smov 0   ;;  %s1175_s12 = smov 0  }
   0x7   :  { %s1177_s13 = smov 0   ;;  %s1179_s14 = smov 0  }
   0x8   :  { %s1181_s15 = smov 0   ;;  %s1183_s16 = smov 0  }
   0x9   :  { %s1185_s17 = smov 0   ;;  %s1187_s18 = smov 0  }
   0xa   :  { %s1189_s19 = smov 0  }
   0xb LB: > { %1547 = sst [smem:[#allocation13_spill]] %s1124_s14  ;;  %s719_s20 = sadd.s32 4294967295, %s1144_s19   ;;  %s1144_s19 = sphi %s1189_s19, %s21_s19   ;;  %s1140_s18 = sphi %s1187_s18, %s1578_s18   ;;  %s1136_s17 = sphi %s1185_s17, %s1570_s17   ;;  %s1132_s16 = sphi %s1183_s16, %s1577_s16   ;;  %s1128_s15 = sphi %s1181_s15, %s1569_s15   ;;  %s1124_s14 = sphi %s1179_s14, %s1568_s14   ;;  %s1120_s13 = sphi %s1177_s13, %s1576_s13   ;;  %s1116_s12 = sphi %s1175_s12, %s1575_s12   ;;  %s1112_s11 = sphi %s1173_s11, %s1574_s11   ;;  %s1108_s10 = sphi %s1171_s10, %s1573_s10   ;;  %s1104_s9 = sphi %s1169_s9, %s1572_s9  }
   0xc   : > { %1548 = sst [smem:[#allocation14_spill]] %s1136_s17  ;;  %s720_s21 = sadd.s32 4294967294, %s1144_s19  }
   0xd   : > { %s30_s22 = sadd.s32 1, %s1136_s17  ;;  %s33_s23 = sadd.s32 1, %s1140_s18 }
   0xe   : > { %p31_p0 = scmp.ge.s32.totalorder %s30_s22, 8  ;;  %s721_s24 = sshll.u32 %s1136_s17, 1 }
   0xf   : > { %s38_s25 = ssub.s32 7, %s721_s24  ;;  %s50_s26 = sadd.s32 1, %s1124_s14 }
  0x10   : > { %s1580_s22 = smov (%p31_p0, %s30_s22), 0  ;;  %s1582_s23 = smov (!%p31_p0, %s33_s23), %s1140_s18 }
  0x11   : > { %1549 = sst [smem:[#allocation15_spill]] %s1580_s22  ;;  %s39_s27 = smul.u32 %s1140_s18, %s38_s25 }
  0x12   : > { %s722_s28 = sshll.u32 %s1580_s22, 1  ;;  %p35_p1 = scmp.ge.s32.totalorder %s1582_s23, 2 }
  0x13   : > { %s42_s29 = ssub.s32 7, %s722_s28  ;;  %s1236_s30 = sadd.s32 %s1136_s17, %s39_s27 }
  0x14   : > { %p57_p2 = scmp.ne.s32.totalorder %s1124_s14, %s1120_s13  ;;  %s1584_s23 = smov (%p35_p1, %s1582_s23), 0 }
  0x15   : > { %1550 = sst [smem:[#allocation16_spill]] %s1584_s23  ;;  %p58_p3 = scmp.eq.s32.totalorder %s1144_s19, 0 }
  0x16   : > { %p63_p4 = scmp.ne.s32.totalorder %s1120_s13, %s1116_s12  ;;  %s43_s3 = smul.u32 %s42_s29, %s1584_s23 }
  0x17   : > { %s45_s4 = ssub.s32 %s1140_s18, %s1584_s23  ;;  %p1253_p5 = por %p58_p3, %p57_p2 }
  0x18   : > { %p1259_p6 = scmp.eq.s32.totalorder %s719_s20, 0  ;;  %s44_s7 = sadd.s32 %s43_s3, %s1580_s22 }
  0x19   : > { %p74_p7 = scmp.eq.s32.totalorder %s45_s4, 0  ;;  %s46_s8 = ssub.s32 %s1236_s30, %s44_s7 }
  0x1a   : > { %p1270_p8 = por %p1259_p6, %p63_p4  ;;  %s47_s25 = sor.u32 %s46_s8, %s45_s4 }
  0x1b   : > { %s76_s27 = sadd.s32 1, %s1112_s11  ;;  %p48_p9 = scmp.eq.s32.totalorder %s47_s25, 0 }
  0x1c   : > { %s1553_s24 = scalar_select %p1270_p8, 1, 0 }
  0x1d   : > { %p83_p10 = scmp.ne.s32.totalorder %s1112_s11, %s1108_s10  ;;  %p89_p12 = scmp.ne.s32.totalorder %s1108_s10, %s1104_s9 }
  0x1e   : > { %s1278_s28 = scalar_select %p74_p7, %s1112_s11, %s76_s27  }
  0x1f   : > { %s1281_s29 = scalar_select %p48_p9, %s1124_s14, %s50_s26  }
  0x20   : > { %p1285_p11 = por %p83_p10, %p58_p3  ;;  %p123_p13 = scmp.eq.s32.totalorder %s719_s20, 15 }
  0x21   : > { %1554 = sst [smem:[#allocation17_spill]] %s1281_s29  ;;  %p129_p0 = scmp.eq.s32.totalorder %s720_s21, 15 }
  0x22   : > { %p1297_p1 = por %p89_p12, %p1259_p6  ;;  %p1304_p7 = por %p123_p13, %p57_p2 }
  0x23   : > { %p1311_p3 = por %p129_p0, %p63_p4  ;;  %p799_p9 = scmp.lt.s32.totalorder %s1144_s19, 16 }
  0x24   : > { %s1556_s4 = scalar_select %p1297_p1, 1, 0 }
  0x25   : > { %s1557_s26 = scalar_select %p1304_p7, 1, 0 }
  0x26   : > { %s1558_s9 = scalar_select %p1311_p3, 1, 0 }
  0x27   : > { %s149_s20 = sand.u32 1, %s1124_s14   ;;  %s729_s6 = sshll.u32 %s1236_s30, 2 }
  0x28   : > { %s727_s21 = sshll.u32 %s149_s20, 3  ;;  %s730_s7 = sshll.u32 %s1140_s18, 5 }
  0x29   : > { %s153_s8 = scalar_lea.vmem [#allocation4], %s727_s21  ;;  %s163_s27 = sadd.s32 %s730_s7, %s729_s6 }
  0x2a   : > { %s167_s25 = sshll.u32 %s153_s8, 4  ;;  %s731_s23 = sshll.u32 %s163_s27, 5  ;;  %s1319_s25 = int_to_ptr.vmem [resolvable:$true] %s167_s25 }
  0x2b   : > { %p1323_p2 = pnand %p799_p9, %p1253_p5  ;;  %s1330_s14 = scalar_lea.hbm %s1537_s0, %s731_s23 }
  0x2c   : > { %p1334_p4 = pnand %p799_p9, %p1285_p11  ;;  %s150_s5 = scalar_lea.sflag [#allocation5], %s149_s20 }
  0x2d   : > { %s958_s21 = scalar_lea.hbm %s1330_s14, 128  ;;  %p960_p10 = pneg %p1323_p2 }
  0x2e   : > { %p959_p6 = scmp.ne.s32.totalorder %s1330_s14, %s958_s21  ;;  %s963_s29 = scalar_lea.hbm %s1537_s0, 2048 }
  0x2f   : > { %p964_p11 = scmp.lt.u32.totalorder %s1330_s14, %s1537_s0  ;;  %p965_p0 = scmp.lt.u32.totalorder %s963_s29, %s958_s21 }
  0x30   : > { %p961_p12 = pnand %p960_p10, %p959_p6  ;;  %p967_p5 = scmp.lt.u32.totalorder %s958_s21, %s1330_s14 }
  0x31   : > { %p966_p9 = por %p965_p0, %p964_p11 }
  0x32   : > { %p962_p13 = pneg %p961_p12 }
  0x33   : > { %p968_p3 = por %p967_p5, %p966_p9 }
  0x35   : > { %p969_p7 = pnand %p968_p3, %p962_p13 }
  0x37   : > { %972 = shalt.err (!%p969_p7)
}
  0x38   : > { %s973_s20 = scalar_lea.vmem %s1319_s25, 128  ;;  %s1146_s7 = smov [#allocation4]  }
  0x39   : > { %p974_p6 = scmp.ne.s32.totalorder %s1319_s25, %s973_s20  ;;  %s978_s8 = sshll.u32 %s1146_s7, 4  ;;  %s979_s8 = int_to_ptr.vmem [resolvable:$false] %s978_s8 }
  0x3a   : > { %s980_s27 = scalar_lea.vmem %s979_s8, 256  ;;  %p981_p8 = scmp.lt.s32.totalorder %s1319_s25, %s979_s8 }
  0x3b   : > { %p976_p12 = pnand %p974_p6, %p960_p10  ;;  %p982_p11 = scmp.lt.s32.totalorder %s980_s27, %s973_s20 }
  0x3d   : > { %p977_p1 = pneg %p976_p12  ;;  %p983_p0 = por %p982_p11, %p981_p8 }
  0x3f   : > { %p984_p5 = pnand %p983_p0, %p977_p1 }
  0x41   : > { %987 = shalt.err (!%p984_p5)
}
  0x42   : > { %791 = dma.hbm_to_vmem [thread:$0]  (!%p1323_p2), %s1330_s14, 128, %s1319_s25, %s150_s5  }
  0x43   : > { %p193_p7 = scmp.lt.s32.totalorder %s1144_s19, 17  ;;  %s174_s21 = sand.u32 1, %s1112_s11  }
  0x44   : > { %s781_s17 = sshll.u32 %s1140_s18, 12  ;;  %p1561_p3 = scmp.ge.s32.totalorder %s1144_s19, 1 }
  0x45   : > { %s732_s29 = sshll.u32 %s174_s21, 8  ;;  %s1376_s6 = scalar_lea.hbm %s1538_s1, %s781_s17 }
  0x46   : > { %p1369_p10 = pnand %p1561_p3, %p193_p7  ;;  %s178_s20 = scalar_lea.vmem [#allocation7], %s732_s29 }
  0x47   : > { %s185_s14 = sshll.u32 %s178_s20, 4  ;;  %s1380_s25 = scalar_lea.sflag [#allocation8], %s174_s21  ;;  %s1378_s14 = int_to_ptr.vmem [resolvable:$true] %s185_s14 }
  0x48   : > { %s988_s5 = scalar_lea.hbm %s1376_s6, 4096  ;;  %p990_p1 = pneg %p1334_p4 }
  0x49   : > { %p989_p8 = scmp.ne.s32.totalorder %s1376_s6, %s988_s5  ;;  %s993_s27 = scalar_lea.hbm %s1538_s1, 8192 }
  0x4a   : > { %p994_p9 = scmp.lt.u32.totalorder %s1376_s6, %s1538_s1  ;;  %p995_p6 = scmp.lt.u32.totalorder %s993_s27, %s988_s5 }
  0x4b   : > { %p991_p2 = pnand %p990_p1, %p989_p8  ;;  %p997_p11 = scmp.lt.u32.totalorder %s988_s5, %s1376_s6 }
  0x4c   : > { %p996_p12 = por %p995_p6, %p994_p9 }
  0x4d   : > { %p992_p13 = pneg %p991_p2 }
  0x4e   : > { %p998_p0 = por %p997_p11, %p996_p12 }
  0x50   : > { %p999_p5 = pnand %p998_p0, %p992_p13 }
  0x52   : > { %1002 = shalt.err (!%p999_p5)
}
  0x53   : > { %s1003_s21 = scalar_lea.vmem %s1378_s14, 4096  ;;  %s1147_s29 = smov [#allocation7]  }
  0x54   : > { %p1004_p7 = scmp.ne.s32.totalorder %s1378_s14, %s1003_s21  ;;  %s1008_s22 = sshll.u32 %s1147_s29, 4  ;;  %s1009_s22 = int_to_ptr.vmem [resolvable:$false] %s1008_s22 }
  0x55   : > { %s1010_s20 = scalar_lea.vmem %s1009_s22, 8192  ;;  %p1011_p2 = scmp.lt.s32.totalorder %s1378_s14, %s1009_s22 }
  0x56   : > { %p1006_p3 = pnand %p1004_p7, %p990_p1  ;;  %p1012_p9 = scmp.lt.s32.totalorder %s1010_s20, %s1003_s21 }
  0x58   : > { %p1007_p8 = pneg %p1006_p3  ;;  %p1013_p6 = por %p1012_p9, %p1011_p2 }
  0x5a   : > { %p1014_p12 = pnand %p1013_p6, %p1007_p8 }
  0x5c   : > { %1017 = shalt.err (!%p1014_p12)
}
  0x5d   : > { %s1148_s5 = smov 256   ;;  %s1149_s7 = smov 16  }
  0x5e   : > { %794 = dma.hbm_to_vmem [thread:$0]  (!%p1334_p4), %s1376_s6, 4096, %s1378_s14, %s1380_s25, %s1148_s5, %s1148_s5, %s1149_s7  }
  0x5f   : > { %197 = sbr.rel (%p1369_p10) target bundleno = 430 (0x1ae), region = 28  ;;  %s1411_s8 = sand.u32 (!%p1369_p10), 1, %s1120_s13  }
  0x60   : > { %s736_s27 = sshll.u32 (!%p1369_p10), %s1411_s8, 3  ;;  %s200_s17 = scalar_lea.sflag (!%p1369_p10), [#allocation5], %s1411_s8 }
  0x61   : > { %s1415_s3 = scalar_lea.vmem (!%p1369_p10), [#allocation4], %s736_s27  ;;  %p1563_p1 = scmp.ne.s32.totalorder (!%p1369_p10), %s1553_s24, 0 }
  0x66   : > { %1091 = dma.done.wait (%p1563_p1), %s200_s17, 128  }
  0x67   : > { %1093 = vsyncadd (%p1563_p1), %s200_s17, 4294967168  ;;  %s208_s30 = sand.u32 1, %s1108_s10   ;;  %p1564_p4 = scmp.ne.s32.totalorder %s1556_s4, 0 }
  0x68   : > { %s737_s23 = sshll.u32 %s208_s30, 8  ;;  %s209_s6 = scalar_lea.sflag [#allocation8], %s208_s30 }
  0x69   : > { %s1422_s14 = scalar_lea.vmem [#allocation7], %s737_s23 }
  0x6a   : > { %1095 = dma.done.wait (%p1564_p4), %s209_s6, 4096  }
  0x6b   : > { %1097 = vsyncadd (%p1564_p4), %s209_s6, 4294963200  ;;  %s738_s25 = sshll.u32 %s1411_s8, 1  ;;  %p739_p10 = scmp.ne.s32.totalorder %s1128_s15, 0 }
  0x6c   : > { %s1429_s21 = scalar_lea.vmem [#allocation9], %s738_s25  ;;  %v1150_v0 = vmov (!%p739_p10), 0.0  }
  0x6d   : > { %250 = sbr.rel (%p739_p10) target bundleno = 116 (0x74), region = 40  ;;  %251 = vst [vmem:[#allocation2] sm:$0x3] (!%p739_p10), %v1150_v0  ;;  %252 = vst [vmem:[#allocation3] sm:$0x3] (!%p739_p10), %v1150_v0 }
  0x74 PF: > { %v894_v1 = vld [vmem:[%s1422_s14 + $0x4] ss:$16 sps:$4 sm:$0xff]   ;;  %v896_v2 = vld [vmem:[%s1422_s14 + $0xc] ss:$16 sps:$4 sm:$0xff]   ;;  %v1151_v3 = vmov 0   ;;  %v539_v38 = vlaneseq  ;;  %s776_s24 = sshll.u32 %s1128_s15, 1 }
  0x75   : > { %480 = vmatprep.mubr.bf16.mxu0 %v1151_v3  ;;  %521 = vmatprep.mubr.bf16.mxu1 %v1151_v3  ;;  %v898_v4 = vld [vmem:[%s1422_s14] ss:$16 sps:$4 sm:$0xff]   ;;  %v899_v5 = vld [vmem:[%s1422_s14 + $0x8] ss:$16 sps:$4 sm:$0xff]   ;;  %v900_v6 = vld [vmem:[%s1422_s14 + $0x24] ss:$16 sps:$4 sm:$0xff]  }
  0x76   : > { %448 = vmatprep.subr.bf16.mxu0 %v894_v1  ;;  %489 = vmatprep.subr.bf16.mxu1 %v896_v2  ;;  %v902_v7 = vld [vmem:[%s1422_s14 + $0x2c] ss:$16 sps:$4 sm:$0xff]   ;;  %v904_v8 = vld [vmem:[%s1422_s14 + $0x20] ss:$16 sps:$4 sm:$0xff]   ;;  %v905_v9 = vld [vmem:[%s1422_s14 + $0x28] ss:$16 sps:$4 sm:$0xff]  }
  0x77   : > { %449 = vmatpush1.bf16.msra.mxu0 %v898_v4  ;;  %490 = vmatpush1.bf16.msra.mxu1 %v899_v5  ;;  %v906_v10 = vld [vmem:[%s1422_s14 + $0x44] ss:$16 sps:$4 sm:$0xff]   ;;  %v908_v11 = vld [vmem:[%s1422_s14 + $0x4c] ss:$16 sps:$4 sm:$0xff]   ;;  %v910_v12 = vld [vmem:[%s1422_s14 + $0x40] ss:$16 sps:$4 sm:$0xff]  }
  0x78   : > { %450 = vmatprep.subr.bf16.mxu0 %v900_v6  ;;  %491 = vmatprep.subr.bf16.mxu1 %v902_v7  ;;  %v911_v13 = vld [vmem:[%s1422_s14 + $0x48] ss:$16 sps:$4 sm:$0xff]   ;;  %v912_v14 = vld [vmem:[%s1422_s14 + $0x64] ss:$16 sps:$4 sm:$0xff]   ;;  %v914_v15 = vld [vmem:[%s1422_s14 + $0x6c] ss:$16 sps:$4 sm:$0xff]  }
  0x79   : > { %v916_v16 = vld [vmem:[%s1422_s14 + $0x60] ss:$16 sps:$4 sm:$0xff]   ;;  %v917_v17 = vld [vmem:[%s1422_s14 + $0x68] ss:$16 sps:$4 sm:$0xff]   ;;  %v918_v18 = vld [vmem:[%s1422_s14 + $0x84] ss:$16 sps:$4 sm:$0xff]  }
  0x7a   : > { %v920_v19 = vld [vmem:[%s1422_s14 + $0x8c] ss:$16 sps:$4 sm:$0xff]   ;;  %v922_v20 = vld [vmem:[%s1422_s14 + $0x80] ss:$16 sps:$4 sm:$0xff]   ;;  %v923_v21 = vld [vmem:[%s1422_s14 + $0x88] ss:$16 sps:$4 sm:$0xff]  }
  0x7b   : > { %451 = vmatpush1.bf16.msra.mxu0 %v904_v8  ;;  %492 = vmatpush1.bf16.msra.mxu1 %v905_v9  ;;  %v924_v22 = vld [vmem:[%s1422_s14 + $0xa4] ss:$16 sps:$4 sm:$0xff]   ;;  %v926_v23 = vld [vmem:[%s1422_s14 + $0xac] ss:$16 sps:$4 sm:$0xff]   ;;  %v928_v24 = vld [vmem:[%s1422_s14 + $0xa0] ss:$16 sps:$4 sm:$0xff]  }
  0x7c   : > { %452 = vmatprep.subr.bf16.mxu0 %v906_v10  ;;  %493 = vmatprep.subr.bf16.mxu1 %v908_v11  ;;  %v929_v25 = vld [vmem:[%s1422_s14 + $0xa8] ss:$16 sps:$4 sm:$0xff]   ;;  %v930_v26 = vld [vmem:[%s1422_s14 + $0xc4] ss:$16 sps:$4 sm:$0xff]   ;;  %v932_v27 = vld [vmem:[%s1422_s14 + $0xcc] ss:$16 sps:$4 sm:$0xff]  }
  0x7d   : > { %v934_v28 = vld [vmem:[%s1422_s14 + $0xc0] ss:$16 sps:$4 sm:$0xff]   ;;  %v935_v29 = vld [vmem:[%s1422_s14 + $0xc8] ss:$16 sps:$4 sm:$0xff]   ;;  %v936_v30 = vld [vmem:[%s1422_s14 + $0xe4] ss:$16 sps:$4 sm:$0xff]  }
  0x7e   : > { %v938_v31 = vld [vmem:[%s1422_s14 + $0xec] ss:$16 sps:$4 sm:$0xff]   ;;  %v940_v32 = vld [vmem:[%s1422_s14 + $0xe0] ss:$16 sps:$4 sm:$0xff]   ;;  %v941_v33 = vld [vmem:[%s1422_s14 + $0xe8] ss:$16 sps:$4 sm:$0xff]  }
  0x7f   : > { %453 = vmatpush1.bf16.msra.mxu0 %v910_v12  ;;  %494 = vmatpush1.bf16.msra.mxu1 %v911_v13  ;;  %v254_v34 = vld [vmem:[#allocation2] sm:$0x3]  ;;  %v1152_v36 = vmov 1983009808   ;;  %v540_v40 = vshrl.u32 %v539_v38, 7  ;;  %v253_v54 = vld [vmem:[%s1415_s3] sm:$0xff] }
  0x80   : > { %454 = vmatprep.subr.bf16.mxu0 %v912_v14  ;;  %495 = vmatprep.subr.bf16.mxu1 %v914_v15  ;;  %v255_v35 = vpack.c.bf16 %v254_v34, %v254_v34  ;;  %v537_v37 = vunpack.c.l.s4 %v1152_v36  ;;  %s597_s4 = ssub.s32 7, %s776_s24  ;;  %v579_v5 = vld [vmem:[#allocation3] sm:$0x3]  ;;  %s608_s27 = sshll.u32 %s1429_s21, 4  ;;  %s1475_s27 = int_to_ptr.vmem [resolvable:$true] %s608_s27 }
  0x81   : > { %s598_s29 = smul.u32 %s1132_s16, %s597_s4  ;;  %s1018_s23 = scalar_lea.vmem %s1475_s27, 32 }
  0x82   : > { %v538_v39 = vunpack.c.0.s8 %v537_v37  ;;  %p1019_p13 = scmp.ne.s32.totalorder %s1475_s27, %s1018_s23  ;;  %p1565_p11 = scmp.ne.s32.totalorder %s1557_s26, 0 }
  0x83   : > { %455 = vmatpush1.bf16.msra.mxu0 %v916_v16  ;;  %496 = vmatpush1.bf16.msra.mxu1 %v917_v17  ;;  %s599_s22 = sadd.s32 %s1128_s15, %s598_s29  ;;  %s589_s15 = scalar_lea.sflag [#allocation6], %s1411_s8 }
  0x84   : > { %456 = vmatprep.subr.bf16.mxu0 %v918_v18  ;;  %497 = vmatprep.subr.bf16.mxu1 %v920_v19  ;;  %v541_v43 = vsub.s32 %v538_v39, %v540_v40  ;;  %s777_s20 = sshll.u32 %s599_s22, 1  ;;  %p1020_p0 = pnand %p1019_p13, %p1565_p11 }
  0x85   : > { %s604_s5 = sadd.s32 %s1132_s16, %s777_s20  ;;  %s1153_s16 = smov [#allocation9]  }
  0x86   : > { %s778_s7 = sshll.u32 %s604_s5, 5  ;;  %p1021_p5 = pneg %p1020_p0 }
  0x87   : > { %457 = vmatpush1.bf16.msra.mxu0 %v922_v20  ;;  %498 = vmatpush1.bf16.msra.mxu1 %v923_v21  ;;  %s1473_s30 = scalar_lea.hbm %s1539_s2, %s778_s7  ;;  %s1022_s6 = sshll.u32 %s1153_s16, 4  ;;  %s1023_s6 = int_to_ptr.vmem [resolvable:$false] %s1022_s6 }
  0x88   : > { %458 = vmatprep.subr.bf16.mxu0 %v924_v22  ;;  %499 = vmatprep.subr.bf16.mxu1 %v926_v23  ;;  %s1024_s14 = scalar_lea.vmem %s1023_s6, 64  ;;  %p1025_p7 = scmp.lt.s32.totalorder %s1475_s27, %s1023_s6 }
  0x89   : > { %p1026_p3 = scmp.lt.s32.totalorder %s1024_s14, %s1018_s23 }
  0x8b   : > { %459 = vmatpush1.bf16.msra.mxu0 %v928_v24  ;;  %500 = vmatpush1.bf16.msra.mxu1 %v929_v25  ;;  %p1027_p8 = por %p1026_p3, %p1025_p7 }
  0x8c   : > { %460 = vmatprep.subr.bf16.mxu0 %v930_v26  ;;  %501 = vmatprep.subr.bf16.mxu1 %v932_v27 }
  0x8d   : > { %p1028_p2 = pnand %p1027_p8, %p1021_p5 }
  0x8f   : > { %461 = vmatpush1.bf16.msra.mxu0 %v934_v28  ;;  %502 = vmatpush1.bf16.msra.mxu1 %v935_v29 }
  0x90   : > { %462 = vmatprep.subr.bf16.mxu0 %v936_v30  ;;  %503 = vmatprep.subr.bf16.mxu1 %v938_v31 }
  0x93   : > { %463 = vmatpush1.bf16.msra.mxu0 %v940_v32  ;;  %504 = vmatpush1.bf16.msra.mxu1 %v941_v33 }
  0x96   : > { %481 = vmatmul.mubr.bf16.vlgmr.msra.gmra.mrb[0].mxu0 %v255_v35  ;;  %522 = vmatmul.mubr.bf16.vlgmr.msra.gmra.mrb[0].mxu1 %v255_v35 }
 0x169   : > { %v482_v41 = vpop.f32.mrb[0].mxu0  ;;  %v523_v42 = vpop.f32.mrb[0].mxu1 }
 0x16a   : > { %v484_v44 = vpop.f32.mrb[1].mxu0  ;;  %v525_v45 = vpop.f32.mrb[1].mxu1 }
 0x16b   : > { %v534_v46 = vcombine.low %v482_v41, %v484_v44  ;;  %v535_v47 = vcombine.low %v523_v42, %v525_v45  ;;  %v486_v48 = vpop.f32.mrb[2].mxu0  ;;  %v527_v49 = vpop.f32.mrb[2].mxu1 }
 0x16c   : > { %v487_v50 = vpop.f32.mrb[3].mxu0  ;;  %v528_v51 = vpop.f32.mrb[3].mxu1 }
 0x16d   : > { %v542_v52 = vrot.slane %v534_v46, %v541_v43  ;;  %v549_v53 = vrot.slane %v535_v47, %v541_v43 }
 0x16f   : > { %v550_v55 = vcombine.low %v542_v52, %v549_v53 }
 0x171   : > { %v552_v56 = vadd.f32 %v550_v55, %v253_v54 }
 0x173   : > { %v772_v57 = vmul.f32 -1.442695, %v552_v56  ;;  %v560_v58 = vrot.slane %v552_v56, 2  ;;  %v571_v60 = vrot.slane %v552_v56, 6  ;;  %v568_v63 = vrot.slane %v552_v56, 4 }
 0x175   : > { %942 = vpow2.f32 %v772_v57  ;;  %v773_v59 = vmul.f32 -1.442695, %v560_v58  ;;  %v774_v61 = vmul.f32 -1.442695, %v571_v60 }
 0x177   : > { %944 = vpow2.f32 %v773_v59 }
 0x178   : > { %946 = vpow2.f32 %v774_v61 }
 0x17f   : > { %v943_v62 = vpop.eup %942 }
 0x180   : > { %v556_v0 = vadd.f32 1.0, %v943_v62 }
 0x181   : > { %v945_v1 = vpop.eup %944 }
 0x182   : > { %948 = vrcp.f32 %v556_v0  ;;  %v565_v2 = vadd.f32 1.0, %v945_v1  ;;  %v947_v3 = vpop.eup %946 }
 0x183   : > { %950 = vtanh.f32 %v568_v63  ;;  %v576_v8 = vadd.f32 1.0, %v947_v3 }
 0x184   : > { %952 = vrcp.f32 %v565_v2 }
 0x185   : > { %954 = vrcp.f32 %v576_v8 }
 0x18c   : > { %v949_v4 = vpop.eup %948 }
 0x18d   : > { %v951_v6 = vpop.eup %950 }
 0x18e   : > { %v953_v7 = vpop.eup %952  ;;  %v581_v10 = vmul.f32 %v951_v6, %v949_v4 }
 0x18f   : > { %v580_v9 = vmul.f32 %v953_v7, %v579_v5  ;;  %v955_v12 = vpop.eup %954 }
 0x191   : > { %v582_v11 = vadd.f32 %v581_v10, %v580_v9 }
 0x193   : > { %956 = vtanh.f32 %v582_v11  ;;  %585 = vst [vmem:[#allocation3] sm:$0x3] %v582_v11 }
 0x19d   : > { %v957_v13 = vpop.eup %956 }
 0x19e   : > { %v584_v14 = vmul.f32 %v957_v13, %v955_v12 }
 0x1a0   : > { %586 = vst [vmem:[#allocation2] sm:$0x3] %v584_v14  ;;  %587 = vst [vmem:[%s1429_s21] sm:$0x3] %v584_v14 }
 0x1a1   : > { %1031 = shalt.err (!%p1028_p2)
}
 0x1a2   : > { %s1032_s8 = scalar_lea.hbm %s1473_s30, 32  ;;  %s1036_s24 = scalar_lea.hbm %s1539_s2, 512 }
 0x1a3   : > { %p1033_p9 = scmp.ne.s32.totalorder %s1473_s30, %s1032_s8  ;;  %p1037_p1 = scmp.lt.u32.totalorder %s1473_s30, %s1539_s2 }
 0x1a4   : > { %p1038_p4 = scmp.lt.u32.totalorder %s1036_s24, %s1032_s8  ;;  %p1040_p13 = scmp.lt.u32.totalorder %s1032_s8, %s1473_s30 }
 0x1a5   : > { %p1034_p6 = pnand %p1033_p9, %p1565_p11 }
 0x1a6   : > { %p1039_p10 = por %p1038_p4, %p1037_p1 }
 0x1a7   : > { %p1035_p12 = pneg %p1034_p6 }
 0x1a8   : > { %p1041_p0 = por %p1040_p13, %p1039_p10 }
 0x1aa   : > { %p1042_p5 = pnand %p1041_p0, %p1035_p12 }
 0x1ac   : > { %1045 = shalt.err (!%p1042_p5)
}
 0x1ad   : > { %786 = dma.vmem_to_hbm [thread:$0]  (%p1565_p11), %s1475_s27, 32, %s1473_s30, %s589_s15  }
 0x1ae PF: > { %p800_p7 = scmp.ge.s32.totalorder %s1144_s19, 2  ;;  %s620_s22 = sand.u32 1, %s1116_s12  }
 0x1af   : > { %p1566_p3 = scmp.ne.s32.totalorder %s1558_s9, 0  ;;  %s621_s20 = scalar_lea.sflag [#allocation6], %s620_s22 }
 0x1b1   : > { %p796_p8 = pnand %p800_p7, %p1566_p3 }
 0x1b3   : > { %1099 = dma.done.wait (!%p796_p8), %s621_s20, 32  }
 0x1b4   : > { %1101 = vsyncadd (!%p796_p8), %s621_s20, 4294967264  ;;  %s21_s19 = sadd.s32 1, %s1144_s19   ;;  %s1567_s26 = sld [smem:[#allocation13_spill]] }
 0x1b5   : > { %p18_p2 = scmp.ge.s32.totalorder %s21_s19, 18   ;;  %s1568_s14 = sld [smem:[#allocation17_spill]] }
 0x1b6   : > { %s1569_s15 = sld [smem:[#allocation14_spill]]  ;;  %s1570_s17 = sld [smem:[#allocation15_spill]] }
 0x1b7   : > { %s1571_s5 = sld [smem:[#allocation16_spill]]  ;;  %s1572_s9 = smov %s1108_s10 }
 0x1b8   : > { %s1573_s10 = smov %s1112_s11  ;;  %s1574_s11 = smov %s1278_s28 }
 0x1b9   : > { %s1575_s12 = smov %s1120_s13  ;;  %s1577_s16 = smov %s1140_s18 }
 0x1ba   : > { %s1576_s13 = smov %s1567_s26  ;;  %20 = sbr.rel (!%p18_p2) target bundleno = 11 (0xb), region = 90 }
 0x1bd   : > { %s1578_s18 = smov %s1571_s5 }
 0x1c1   :  { %626 = vsyncpa [#allocation5], 1 }
 0x1c2   :  { %628 = vsyncpa [#allocation5 + $0x1], 1 }
 0x1c3   :  { %629 = vsyncpa [#allocation8], 1 }
 0x1c4   :  { %631 = vsyncpa [#allocation8 + $0x1], 1 }
 0x1c5   :  { %632 = vsyncpa [#allocation6], 1 }
 0x1c6   :  { %634 = vsyncpa [#allocation6 + $0x1], 1 }

// kernel: apcb_forward.9
= control target key start
LH: loop header
LB: loop body
LE: loop exit
PB: predicated region body
PF: predicated region fallthrough
CT: control target
= control target key end

     0   :  { %s1715_s0 = inlined_call_operand.hbm [shape: bf16[16,256], index: 0, kind: input, shape index: {}]   ;;  %s1716_s1 = inlined_call_operand.hbm [shape: bf16[2,256,512], index: 1, kind: input, shape index: {}]   ;;  %s1717_s2 = inlined_call_operand.hbm [shape: f32[2,1,512], index: 2, kind: input, shape index: {}]   ;;  %s1718_s3 = inlined_call_operand.hbm [shape: f32[2,16,512], index: 3, kind: output, shape index: {}]  }
   0x1   :  { %1727 = sst [smem:[#allocation13_spill]] %s1716_s1 }
   0x2   :  { %8 = vsyncpa [#allocation3], 0 }
   0x3   :  { %9 = vsyncpa [#allocation6], 0 }
   0x4   :  { %11 = vsyncpa [#allocation6 + $0x1], 0 }
   0x5   :  { %12 = vsyncpa [#allocation4], 0 }
   0x6   :  { %14 = vsyncpa [#allocation4 + $0x1], 0  ;;  %s1390_s12 = smov 0   ;;  %s1392_s13 = smov 0  }
   0x7   :  { %s1394_s14 = smov 0   ;;  %s1396_s15 = smov 0  }
   0x8   :  { %s1398_s16 = smov 0   ;;  %s1400_s17 = smov 0  }
   0x9 LB: > { %s32_s18 = sadd.s32 1, %s1354_s16  ;;  %s65_s19 = sadd.s32 1, %s1346_s14  ;;  %s1358_s17 = sphi %s1400_s17, %s20_s17   ;;  %s1354_s16 = sphi %s1398_s16, %s1751_s16   ;;  %s1350_s15 = sphi %s1396_s15, %s1750_s15   ;;  %s1346_s14 = sphi %s1394_s14, %s1749_s14   ;;  %s1342_s13 = sphi %s1392_s13, %s1748_s13   ;;  %s1338_s12 = sphi %s1390_s12, %s1747_s12  }
   0xa   : > { %p34_p0 = scmp.ge.s32.totalorder %s32_s18, 2  ;;  %p72_p1 = scmp.ne.s32.totalorder %s1346_s14, %s1342_s13 }
   0xb   : > { %p73_p2 = scmp.eq.s32.totalorder %s1358_s17, 0  ;;  %p1027_p5 = scmp.lt.s32.totalorder %s1358_s17, 2 }
   0xc   : > { %s1753_s18 = smov (%p34_p0, %s32_s18), 0  ;;  %s173_s21 = sand.u32 1, %s1358_s17  }
   0xd   : > { %1728 = sst [smem:[#allocation12_spill]] %s1753_s18  ;;  %p74_p4 = por %p73_p2, %p72_p1 }
   0xe   : > { %s62_s20 = ssub.s32 %s1354_s16, %s1753_s18  ;;  %s175_s22 = sand.u32 1, %s1346_s14  }
   0xf   : > { %p63_p6 = scmp.eq.s32.totalorder %s62_s20, 0  ;;  %s998_s23 = sshll.u32 %s1354_s16, 13 }
  0x10   : > { %s916_s25 = sshll.u32 %s175_s22, 9  ;;  %s1729_s1 = sld [smem:[#allocation13_spill]] }
  0x11   : > { %s1438_s24 = scalar_select %p63_p6, %s1346_s14, %s65_s19  }
  0x12   : > { %p1447_p7 = pnand %p1027_p5, %p74_p4  ;;  %s177_s30 = scalar_lea.vmem [#allocation5], %s916_s25 }
  0x13   : > { %s184_s4 = sshll.u32 %s177_s30, 4  ;;  %s1453_s5 = scalar_lea.sflag [#allocation6], %s173_s21  ;;  %s1451_s4 = int_to_ptr.vmem [resolvable:$true] %s184_s4 }
  0x14   : > { %s1730_s29 = scalar_select %p1447_p7, 1, 0 }
  0x15   : > { %p1721_p9 = pneg %p1447_p7 }
  0x16   : > { %s1445_s28 = scalar_lea.hbm %s1729_s1, %s998_s23  ;;  %s1189_s9 = scalar_lea.hbm %s1729_s1, 16384 }
  0x17   : > { %s1184_s6 = scalar_lea.hbm %s1445_s28, 8192  ;;  %p1190_p12 = scmp.lt.u32.totalorder %s1445_s28, %s1729_s1 }
  0x18   : > { %p1185_p8 = scmp.ne.s32.totalorder %s1445_s28, %s1184_s6  ;;  %p1191_p13 = scmp.lt.u32.totalorder %s1189_s9, %s1184_s6 }
  0x19   : > { %p1193_p2 = scmp.lt.u32.totalorder %s1184_s6, %s1445_s28 }
  0x1a   : > { %p1187_p10 = pnand %p1721_p9, %p1185_p8  ;;  %p1192_p0 = por %p1191_p13, %p1190_p12 }
  0x1c   : > { %p1188_p11 = pneg %p1187_p10  ;;  %p1194_p4 = por %p1193_p2, %p1192_p0 }
  0x1e   : > { %p1195_p5 = pnand %p1194_p4, %p1188_p11 }
  0x20   : > { %1198 = shalt.err (!%p1195_p5)
}
  0x21   : > { %s1199_s19 = scalar_lea.vmem %s1451_s4, 8192  ;;  %s1360_s20 = smov [#allocation5]  }
  0x22   : > { %p1200_p6 = scmp.ne.s32.totalorder %s1451_s4, %s1199_s19  ;;  %s1204_s21 = sshll.u32 %s1360_s20, 4  ;;  %s1205_s21 = int_to_ptr.vmem [resolvable:$false] %s1204_s21 }
  0x23   : > { %s1206_s23 = scalar_lea.vmem %s1205_s21, 16384  ;;  %p1207_p3 = scmp.lt.s32.totalorder %s1451_s4, %s1205_s21 }
  0x24   : > { %p1202_p8 = pnand %p1200_p6, %p1721_p9  ;;  %p1208_p12 = scmp.lt.s32.totalorder %s1206_s23, %s1199_s19 }
  0x26   : > { %p1203_p10 = pneg %p1202_p8  ;;  %p1209_p13 = por %p1208_p12, %p1207_p3 }
  0x28   : > { %p1210_p0 = pnand %p1209_p13, %p1203_p10 }
  0x2a   : > { %1213 = shalt.err (!%p1210_p0)
}
  0x2b   : > { %s1361_s25 = smov 256   ;;  %s1362_s26 = smov 16  }
  0x2c   : > { %1018 = dma.hbm_to_vmem [thread:$0]  (!%p1447_p7), %s1445_s28, 8192, %s1451_s4, %s1453_s5, %s1361_s25, %s1361_s25, %s1362_s26  }
  0x2d   : > { %s1482_s27 = sadd.s32 4294967295, %s1358_s17   ;;  %s912_s30 = sadd.s32 4294967294, %s1358_s17  }
  0x2e   : > { %p78_p3 = scmp.ne.s32.totalorder %s1342_s13, %s1338_s12  ;;  %p1720_p11 = scmp.eq.s32.totalorder %s1482_s27, 0 }
  0x2f   : > { %p130_p2 = scmp.eq.s32.totalorder %s1482_s27, 1  ;;  %p136_p4 = scmp.eq.s32.totalorder %s912_s30, 1 }
  0x30   : > { %p913_p5 = scmp.ge.s32.totalorder %s1358_s17, 1  ;;  %p1492_p6 = por %p1720_p11, %p78_p3 }
  0x31   : > { %p1499_p8 = por %p130_p2, %p72_p1  ;;  %p1503_p10 = por %p136_p4, %p78_p3 }
  0x32   : > { %s1731_s6 = scalar_select %p1492_p6, 1, 0 }
  0x33   : > { %s1732_s28 = scalar_select %p1499_p8, 1, 0 }
  0x34   : > { %s1733_s4 = scalar_select %p1503_p10, 1, 0 }
  0x35   : > { %p143_p12 = scmp.lt.s32.totalorder %s1358_s17, 3  ;;  %s1363_s8 = smov [#allocation2]  }
  0x36   : > { %s159_s9 = sshll.u32 %s1363_s8, 4  ;;  %s919_s10 = sshll.u32 %s175_s22, 2  ;;  %s1512_s9 = int_to_ptr.vmem [resolvable:$true] %s159_s9 }
  0x37   : > { %p1508_p13 = pnand %p913_p5, %p143_p12  ;;  %s999_s11 = sshll.u32 %s1354_s16, 6 }
  0x38   : > { %s1528_s23 = scalar_lea.hbm %s1717_s2, %s999_s11  ;;  %s198_s25 = scalar_lea.vmem [#allocation7], %s919_s10 }
  0x39   : > { %s1734_s7 = scalar_select %p1508_p13, 1, 0 }
  0x3a   : > { %p1011_p0 = pneg %p1508_p13  ;;  %s206_s26 = sshll.u32 %s198_s25, 4  ;;  %s1530_s26 = int_to_ptr.vmem [resolvable:$true] %s206_s26 }
  0x3b   : > { %s1214_s22 = scalar_lea.hbm %s1715_s0, 256 }
  0x3c   : > { %p1521_p1 = pnand %p1011_p0, %p1720_p11  ;;  %p1215_p3 = scmp.ne.s32.totalorder %s1715_s0, %s1214_s22 }
  0x3d   : > { %p1221_p12 = scmp.lt.u32.totalorder %s1214_s22, %s1715_s0 }
  0x3e   : > { %p1216_p2 = pneg %p1521_p1 }
  0x40   : > { %p1217_p4 = pnand %p1216_p2, %p1215_p3 }
  0x42   : > { %p1218_p5 = pneg %p1217_p4 }
  0x44   : > { %p1223_p0 = pnand %p1221_p12, %p1218_p5 }
  0x46   : > { %1226 = shalt.err (!%p1223_p0)
}
  0x47   : > { %s1227_s10 = scalar_lea.vmem %s1512_s9, 256  ;;  %p1235_p8 = scmp.lt.s32.totalorder %s1512_s9, %s1512_s9 }
  0x48   : > { %p1228_p11 = scmp.ne.s32.totalorder %s1512_s9, %s1227_s10  ;;  %p1236_p6 = scmp.lt.s32.totalorder %s1227_s10, %s1227_s10 }
  0x4a   : > { %p1230_p9 = pnand %p1228_p11, %p1216_p2  ;;  %p1237_p13 = por %p1236_p6, %p1235_p8 }
  0x4c   : > { %p1231_p10 = pneg %p1230_p9 }
  0x4e   : > { %p1238_p7 = pnand %p1237_p13, %p1231_p10 }
  0x50   : > { %1241 = shalt.err (!%p1238_p7)
}
  0x51   : > { %s1364_s1 = smov 128   ;;  %s1365_s18 = smov 8  }
  0x52   : > { %1014 = dma.hbm_to_vmem [thread:$0]  (!%p1521_p1), %s1715_s0, 256, %s1512_s9, [#allocation3], %s1364_s1, %s1364_s1, %s1365_s18  }
  0x53   : > { %s1242_s30 = scalar_lea.hbm %s1528_s23, 64  ;;  %p1736_p11 = scmp.ne.s32.totalorder %s1730_s29, 0 }
  0x54   : > { %p1243_p9 = scmp.ne.s32.totalorder %s1528_s23, %s1242_s30  ;;  %s1247_s20 = scalar_lea.hbm %s1717_s2, 128 }
  0x55   : > { %p1737_p6 = pneg %p1736_p11  ;;  %p1248_p10 = scmp.lt.u32.totalorder %s1528_s23, %s1717_s2 }
  0x56   : > { %p1249_p13 = scmp.lt.u32.totalorder %s1247_s20, %s1242_s30  ;;  %p1251_p2 = scmp.lt.u32.totalorder %s1242_s30, %s1528_s23 }
  0x57   : > { %p1245_p8 = pnand %p1243_p9, %p1737_p6 }
  0x58   : > { %p1250_p3 = por %p1249_p13, %p1248_p10 }
  0x59   : > { %p1246_p7 = pneg %p1245_p8 }
  0x5a   : > { %p1252_p4 = por %p1251_p2, %p1250_p3 }
  0x5c   : > { %p1253_p5 = pnand %p1252_p4, %p1246_p7 }
  0x5e   : > { %1256 = shalt.err (!%p1253_p5)
}
  0x5f   : > { %s1257_s9 = scalar_lea.vmem %s1530_s26, 64  ;;  %p1738_p12 = pmov %p1737_p6 }
  0x60   : > { %p1258_p1 = scmp.ne.s32.totalorder %s1530_s26, %s1257_s9  ;;  %s1366_s19 = smov [#allocation7]  }
  0x61   : > { %s1262_s1 = sshll.u32 %s1366_s19, 4  ;;  %s1263_s1 = int_to_ptr.vmem [resolvable:$false] %s1262_s1 }
  0x62   : > { %p1260_p0 = pnand %p1258_p1, %p1738_p12  ;;  %s1264_s18 = scalar_lea.vmem %s1263_s1, 128 }
  0x63   : > { %p1265_p6 = scmp.lt.s32.totalorder %s1530_s26, %s1263_s1  ;;  %p1266_p8 = scmp.lt.s32.totalorder %s1264_s18, %s1257_s9 }
  0x64   : > { %p1261_p9 = pneg %p1260_p0 }
  0x65   : > { %p1267_p10 = por %p1266_p8, %p1265_p6 }
  0x67   : > { %p1268_p13 = pnand %p1267_p10, %p1261_p9 }
  0x69   : > { %1271 = shalt.err (!%p1268_p13)
}
  0x6a   : > { %1021 = dma.hbm_to_vmem [thread:$0]  (!%p1736_p11), %s1528_s23, 64, %s1530_s26, %s1453_s5  }
  0x6b   : > { %p1739_p7 = scmp.ne.s32.totalorder %s1734_s7, 0 }
  0x6c   : > { %p1740_p3 = scmp.eq.s32.totalorder (!%p1739_p7), %s1482_s27, 0 }
  0x6d   : > { %215 = sbr.rel (%p1739_p7) target bundleno = 419 (0x1a3), region = 32 }
  0x74   : > { %1325 = dma.done.wait (%p1740_p3), [#allocation3], 256   ;;  %p1741_p2 = pmov %p1740_p3 }
  0x75   : > { %s221_s11 = sand.u32 1, %s1482_s27   ;;  %s1585_s25 = sand.u32 1, %s1342_s13  }
  0x76   : > { %1327 = vsyncadd (%p1741_p2), [#allocation3], 4294967040  ;;  %s924_s29 = sshll.u32 %s1585_s25, 9  ;;  %s222_s30 = scalar_lea.sflag [#allocation6], %s221_s11 }
  0x77   : > { %s1588_s8 = scalar_lea.vmem [#allocation5], %s924_s29  ;;  %p1742_p11 = scmp.ne.s32.totalorder %s1731_s6, 0 }
  0x79   : > { %1329 = dma.done.wait (%p1742_p11), %s222_s30, 8256  }
  0x7a   : > { %1331 = vsyncadd (%p1742_p11), %s222_s30, 4294959040  ;;  %v1085_v0 = vld [vmem:[%s1588_s8 + $0x4] ss:$16 sps:$4 sm:$0xff]   ;;  %v1087_v1 = vld [vmem:[%s1588_s8 + $0xc] ss:$16 sps:$4 sm:$0xff]   ;;  %s925_s5 = sshll.u32 %s1585_s25, 2 }
  0x7b   : > { %682 = vmatprep.subr.bf16.mxu0 %v1085_v0  ;;  %v1089_v2 = vld [vmem:[%s1588_s8] ss:$16 sps:$4 sm:$0xff]   ;;  %v1090_v3 = vld [vmem:[%s1588_s8 + $0x8] ss:$16 sps:$4 sm:$0xff]   ;;  %725 = vmatprep.subr.bf16.mxu1 %v1087_v1  ;;  %v1091_v4 = vld [vmem:[%s1588_s8 + $0x24] ss:$16 sps:$4 sm:$0xff]  }
  0x7c   : > { %683 = vmatpush1.bf16.msra.mxu0 %v1089_v2  ;;  %726 = vmatpush1.bf16.msra.mxu1 %v1090_v3  ;;  %v1093_v5 = vld [vmem:[%s1588_s8 + $0x2c] ss:$16 sps:$4 sm:$0xff]   ;;  %v1095_v6 = vld [vmem:[%s1588_s8 + $0x20] ss:$16 sps:$4 sm:$0xff]   ;;  %v1096_v7 = vld [vmem:[%s1588_s8 + $0x28] ss:$16 sps:$4 sm:$0xff]   ;;  %v332_v2 = vlaneseq }
  0x7d   : > { %684 = vmatprep.subr.bf16.mxu0 %v1091_v4  ;;  %727 = vmatprep.subr.bf16.mxu1 %v1093_v5  ;;  %v1097_v8 = vld [vmem:[%s1588_s8 + $0x44] ss:$16 sps:$4 sm:$0xff]   ;;  %v1099_v9 = vld [vmem:[%s1588_s8 + $0x4c] ss:$16 sps:$4 sm:$0xff]   ;;  %v1101_v10 = vld [vmem:[%s1588_s8 + $0x40] ss:$16 sps:$4 sm:$0xff]  }
  0x7e   : > { %v1102_v11 = vld [vmem:[%s1588_s8 + $0x48] ss:$16 sps:$4 sm:$0xff]   ;;  %v1103_v12 = vld [vmem:[%s1588_s8 + $0x64] ss:$16 sps:$4 sm:$0xff]   ;;  %v1105_v13 = vld [vmem:[%s1588_s8 + $0x6c] ss:$16 sps:$4 sm:$0xff]  }
  0x7f   : > { %v1107_v14 = vld [vmem:[%s1588_s8 + $0x60] ss:$16 sps:$4 sm:$0xff]   ;;  %v1108_v15 = vld [vmem:[%s1588_s8 + $0x68] ss:$16 sps:$4 sm:$0xff]   ;;  %v1109_v16 = vld [vmem:[%s1588_s8 + $0x84] ss:$16 sps:$4 sm:$0xff]  }
  0x80   : > { %685 = vmatpush1.bf16.msra.mxu0 %v1095_v6  ;;  %728 = vmatpush1.bf16.msra.mxu1 %v1096_v7  ;;  %v1111_v17 = vld [vmem:[%s1588_s8 + $0x8c] ss:$16 sps:$4 sm:$0xff]   ;;  %v1113_v18 = vld [vmem:[%s1588_s8 + $0x80] ss:$16 sps:$4 sm:$0xff]   ;;  %v1114_v19 = vld [vmem:[%s1588_s8 + $0x88] ss:$16 sps:$4 sm:$0xff]  }
  0x81   : > { %686 = vmatprep.subr.bf16.mxu0 %v1097_v8  ;;  %729 = vmatprep.subr.bf16.mxu1 %v1099_v9  ;;  %v1115_v20 = vld [vmem:[%s1588_s8 + $0xa4] ss:$16 sps:$4 sm:$0xff]   ;;  %v1117_v21 = vld [vmem:[%s1588_s8 + $0xac] ss:$16 sps:$4 sm:$0xff]   ;;  %v1119_v22 = vld [vmem:[%s1588_s8 + $0xa0] ss:$16 sps:$4 sm:$0xff]  }
  0x82   : > { %v1120_v23 = vld [vmem:[%s1588_s8 + $0xa8] ss:$16 sps:$4 sm:$0xff]   ;;  %v1121_v24 = vld [vmem:[%s1588_s8 + $0xc4] ss:$16 sps:$4 sm:$0xff]   ;;  %v1123_v25 = vld [vmem:[%s1588_s8 + $0xcc] ss:$16 sps:$4 sm:$0xff]  }
  0x83   : > { %v1125_v26 = vld [vmem:[%s1588_s8 + $0xc0] ss:$16 sps:$4 sm:$0xff]   ;;  %v1126_v27 = vld [vmem:[%s1588_s8 + $0xc8] ss:$16 sps:$4 sm:$0xff]   ;;  %v1127_v28 = vld [vmem:[%s1588_s8 + $0xe4] ss:$16 sps:$4 sm:$0xff]  }
  0x84   : > { %687 = vmatpush1.bf16.msra.mxu0 %v1101_v10  ;;  %730 = vmatpush1.bf16.msra.mxu1 %v1102_v11  ;;  %v1129_v29 = vld [vmem:[%s1588_s8 + $0xec] ss:$16 sps:$4 sm:$0xff]   ;;  %v1131_v30 = vld [vmem:[%s1588_s8 + $0xe0] ss:$16 sps:$4 sm:$0xff]   ;;  %v1132_v31 = vld [vmem:[%s1588_s8 + $0xe8] ss:$16 sps:$4 sm:$0xff]  }
  0x85   : > { %688 = vmatprep.subr.bf16.mxu0 %v1103_v12  ;;  %731 = vmatprep.subr.bf16.mxu1 %v1105_v13  ;;  %v1133_v32 = vld [vmem:[%s1588_s8 + $0x104] ss:$16 sps:$4 sm:$0xff]   ;;  %v1135_v33 = vld [vmem:[%s1588_s8 + $0x10c] ss:$16 sps:$4 sm:$0xff]   ;;  %v1137_v34 = vld [vmem:[%s1588_s8 + $0x100] ss:$16 sps:$4 sm:$0xff]  }
  0x86   : > { %v1138_v35 = vld [vmem:[%s1588_s8 + $0x108] ss:$16 sps:$4 sm:$0xff]   ;;  %v1139_v36 = vld [vmem:[%s1588_s8 + $0x124] ss:$16 sps:$4 sm:$0xff]   ;;  %v1141_v37 = vld [vmem:[%s1588_s8 + $0x12c] ss:$16 sps:$4 sm:$0xff]  }
  0x87   : > { %v1143_v38 = vld [vmem:[%s1588_s8 + $0x120] ss:$16 sps:$4 sm:$0xff]   ;;  %v1144_v39 = vld [vmem:[%s1588_s8 + $0x128] ss:$16 sps:$4 sm:$0xff]   ;;  %v1145_v40 = vld [vmem:[%s1588_s8 + $0x144] ss:$16 sps:$4 sm:$0xff]  }
  0x88   : > { %689 = vmatpush1.bf16.msra.mxu0 %v1107_v14  ;;  %732 = vmatpush1.bf16.msra.mxu1 %v1108_v15  ;;  %v1147_v41 = vld [vmem:[%s1588_s8 + $0x14c] ss:$16 sps:$4 sm:$0xff]   ;;  %v1149_v42 = vld [vmem:[%s1588_s8 + $0x140] ss:$16 sps:$4 sm:$0xff]   ;;  %v1150_v43 = vld [vmem:[%s1588_s8 + $0x148] ss:$16 sps:$4 sm:$0xff]  }
  0x89   : > { %690 = vmatprep.subr.bf16.mxu0 %v1109_v16  ;;  %733 = vmatprep.subr.bf16.mxu1 %v1111_v17  ;;  %v1151_v44 = vld [vmem:[%s1588_s8 + $0x164] ss:$16 sps:$4 sm:$0xff]   ;;  %v1153_v45 = vld [vmem:[%s1588_s8 + $0x16c] ss:$16 sps:$4 sm:$0xff]   ;;  %v1155_v47 = vld [vmem:[%s1588_s8 + $0x160] ss:$16 sps:$4 sm:$0xff]  }
  0x8a   : > { %v1183_v46 = vld [vmem:[#allocation2 + $0x4] ss:$8 sps:$4 sm:$0xff]   ;;  %v1156_v48 = vld [vmem:[%s1588_s8 + $0x168] ss:$16 sps:$4 sm:$0xff]   ;;  %v1161_v51 = vld [vmem:[%s1588_s8 + $0x180] ss:$16 sps:$4 sm:$0xff]  }
  0x8b   : > { %v1157_v49 = vld [vmem:[%s1588_s8 + $0x184] ss:$16 sps:$4 sm:$0xff]   ;;  %v1159_v50 = vld [vmem:[%s1588_s8 + $0x18c] ss:$16 sps:$4 sm:$0xff]   ;;  %714 = vmatprep.mubr.bf16.mxu0 %v1183_v46  ;;  %757 = vmatprep.mubr.bf16.mxu1 %v1183_v46  ;;  %v1162_v52 = vld [vmem:[%s1588_s8 + $0x188] ss:$16 sps:$4 sm:$0xff]  }
  0x8c   : > { %691 = vmatpush1.bf16.msra.mxu0 %v1113_v18  ;;  %734 = vmatpush1.bf16.msra.mxu1 %v1114_v19  ;;  %v1163_v53 = vld [vmem:[%s1588_s8 + $0x1a4] ss:$16 sps:$4 sm:$0xff]   ;;  %v1165_v54 = vld [vmem:[%s1588_s8 + $0x1ac] ss:$16 sps:$4 sm:$0xff]   ;;  %v1167_v55 = vld [vmem:[%s1588_s8 + $0x1a0] ss:$16 sps:$4 sm:$0xff]  }
  0x8d   : > { %692 = vmatprep.subr.bf16.mxu0 %v1115_v20  ;;  %735 = vmatprep.subr.bf16.mxu1 %v1117_v21  ;;  %v1168_v56 = vld [vmem:[%s1588_s8 + $0x1a8] ss:$16 sps:$4 sm:$0xff]   ;;  %v1169_v57 = vld [vmem:[%s1588_s8 + $0x1c4] ss:$16 sps:$4 sm:$0xff]   ;;  %v1171_v58 = vld [vmem:[%s1588_s8 + $0x1cc] ss:$16 sps:$4 sm:$0xff]  }
  0x8e   : > { %v1173_v59 = vld [vmem:[%s1588_s8 + $0x1c0] ss:$16 sps:$4 sm:$0xff]   ;;  %v1174_v60 = vld [vmem:[%s1588_s8 + $0x1c8] ss:$16 sps:$4 sm:$0xff]   ;;  %v1175_v61 = vld [vmem:[%s1588_s8 + $0x1e4] ss:$16 sps:$4 sm:$0xff]  }
  0x8f   : > { %v1177_v62 = vld [vmem:[%s1588_s8 + $0x1ec] ss:$16 sps:$4 sm:$0xff]   ;;  %v1179_v63 = vld [vmem:[%s1588_s8 + $0x1e0] ss:$16 sps:$4 sm:$0xff]   ;;  %v1180_v0 = vld [vmem:[%s1588_s8 + $0x1e8] ss:$16 sps:$4 sm:$0xff]  }
  0x90   : > { %693 = vmatpush1.bf16.msra.mxu0 %v1119_v22  ;;  %736 = vmatpush1.bf16.msra.mxu1 %v1120_v23  ;;  %v1181_v1 = vld [vmem:[#allocation2] ss:$8 sps:$4 sm:$0xff]   ;;  %v333_v3 = vshrl.u32 %v332_v2, 7  ;;  %s234_s27 = scalar_lea.vmem [#allocation7], %s925_s5  ;;  %s926_s6 = sshll.u32 %s1585_s25, 6 }
  0x91   : > { %694 = vmatprep.subr.bf16.mxu0 %v1121_v24  ;;  %737 = vmatprep.subr.bf16.mxu1 %v1123_v25  ;;  %v330_v6 = vld [vmem:[%s234_s27] sm:$0xf]  ;;  %s261_s7 = scalar_lea.vmem [#allocation8], %s926_s6  ;;  %s1000_s26 = sshll.u32 %s1350_s15, 10 }
  0x92   : > { %v334_v4 = vsub.s32 0, %v333_v3  ;;  %v342_v5 = vsub.s32 2, %v333_v3  ;;  %v338_v7 = vsub.s32 1, %v333_v3  ;;  %v346_v8 = vsub.s32 3, %v333_v3  ;;  %s793_s23 = sshll.u32 %s261_s7, 4  ;;  %s1666_s20 = scalar_lea.hbm %s1718_s3, %s1000_s26  ;;  %s1661_s23 = int_to_ptr.vmem [resolvable:$true] %s793_s23 }
  0x93   : > { %s777_s21 = scalar_lea.sflag [#allocation4], %s1585_s25  ;;  %s1272_s10 = scalar_lea.vmem %s1661_s23, 1024 }
  0x94   : > { %695 = vmatpush1.bf16.msra.mxu0 %v1125_v26  ;;  %738 = vmatpush1.bf16.msra.mxu1 %v1126_v27  ;;  %v335_v9 = vrot.slane %v330_v6, %v334_v4  ;;  %v343_v10 = vrot.slane %v330_v6, %v342_v5  ;;  %v339_v11 = vrot.slane %v330_v6, %v338_v7  ;;  %p1273_p4 = scmp.ne.s32.totalorder %s1661_s23, %s1272_s10  ;;  %p1743_p5 = scmp.ne.s32.totalorder %s1732_s28, 0 }
  0x95   : > { %696 = vmatprep.subr.bf16.mxu0 %v1127_v28  ;;  %739 = vmatprep.subr.bf16.mxu1 %v1129_v29  ;;  %v347_v12 = vrot.slane %v330_v6, %v346_v8  ;;  %s1367_s9 = smov [#allocation8]  }
  0x96   : > { %p1274_p1 = pnand %p1273_p4, %p1743_p5  ;;  %s1276_s19 = sshll.u32 %s1367_s9, 4  ;;  %s1277_s19 = int_to_ptr.vmem [resolvable:$false] %s1276_s19 }
  0x97   : > { %s1278_s1 = scalar_lea.vmem %s1277_s19, 2048  ;;  %p1279_p0 = scmp.lt.s32.totalorder %s1661_s23, %s1277_s19 }
  0x98   : > { %697 = vmatpush1.bf16.msra.mxu0 %v1131_v30  ;;  %740 = vmatpush1.bf16.msra.mxu1 %v1132_v31  ;;  %p1275_p12 = pneg %p1274_p1  ;;  %p1280_p9 = scmp.lt.s32.totalorder %s1278_s1, %s1272_s10 }
  0x99   : > { %698 = vmatprep.subr.bf16.mxu0 %v1133_v32  ;;  %741 = vmatprep.subr.bf16.mxu1 %v1135_v33 }
  0x9a   : > { %p1281_p6 = por %p1280_p9, %p1279_p0 }
  0x9c   : > { %699 = vmatpush1.bf16.msra.mxu0 %v1137_v34  ;;  %742 = vmatpush1.bf16.msra.mxu1 %v1138_v35  ;;  %p1282_p8 = pnand %p1281_p6, %p1275_p12 }
  0x9d   : > { %700 = vmatprep.subr.bf16.mxu0 %v1139_v36  ;;  %743 = vmatprep.subr.bf16.mxu1 %v1141_v37 }
  0xa0   : > { %701 = vmatpush1.bf16.msra.mxu0 %v1143_v38  ;;  %744 = vmatpush1.bf16.msra.mxu1 %v1144_v39 }
  0xa1   : > { %702 = vmatprep.subr.bf16.mxu0 %v1145_v40  ;;  %745 = vmatprep.subr.bf16.mxu1 %v1147_v41 }
  0xa4   : > { %703 = vmatpush1.bf16.msra.mxu0 %v1149_v42  ;;  %746 = vmatpush1.bf16.msra.mxu1 %v1150_v43 }
  0xa5   : > { %704 = vmatprep.subr.bf16.mxu0 %v1151_v44  ;;  %747 = vmatprep.subr.bf16.mxu1 %v1153_v45 }
  0xa8   : > { %705 = vmatpush1.bf16.msra.mxu0 %v1155_v47  ;;  %748 = vmatpush1.bf16.msra.mxu1 %v1156_v48 }
  0xa9   : > { %706 = vmatprep.subr.bf16.mxu0 %v1157_v49  ;;  %749 = vmatprep.subr.bf16.mxu1 %v1159_v50 }
  0xac   : > { %707 = vmatpush1.bf16.msra.mxu0 %v1161_v51  ;;  %750 = vmatpush1.bf16.msra.mxu1 %v1162_v52 }
  0xad   : > { %708 = vmatprep.subr.bf16.mxu0 %v1163_v53  ;;  %751 = vmatprep.subr.bf16.mxu1 %v1165_v54 }
  0xb0   : > { %709 = vmatpush1.bf16.msra.mxu0 %v1167_v55  ;;  %752 = vmatpush1.bf16.msra.mxu1 %v1168_v56 }
  0xb1   : > { %710 = vmatprep.subr.bf16.mxu0 %v1169_v57  ;;  %753 = vmatprep.subr.bf16.mxu1 %v1171_v58 }
  0xb4   : > { %711 = vmatpush1.bf16.msra.mxu0 %v1173_v59  ;;  %754 = vmatpush1.bf16.msra.mxu1 %v1174_v60 }
  0xb5   : > { %712 = vmatprep.subr.bf16.mxu0 %v1175_v61  ;;  %755 = vmatprep.subr.bf16.mxu1 %v1177_v62 }
  0xb8   : > { %713 = vmatpush1.bf16.msra.mxu0 %v1179_v63  ;;  %756 = vmatpush1.bf16.msra.mxu1 %v1180_v0 }
  0xbb   : > { %715 = vmatmul.mubr.bf16.vlgmr.msra.gmra.mrb[0].mxu0 %v1181_v1  ;;  %758 = vmatmul.mubr.bf16.vlgmr.msra.gmra.mrb[0].mxu1 %v1181_v1 }
 0x18e   : > { %v716_v13 = vpop.f32.mrb[0].mxu0  ;;  %v759_v14 = vpop.f32.mrb[0].mxu1 }
 0x18f   : > { %v717_v15 = vadd.f32 %v716_v13, %v335_v9  ;;  %v760_v16 = vadd.f32 %v759_v14, %v343_v10  ;;  %v718_v17 = vpop.f32.mrb[1].mxu0  ;;  %v761_v18 = vpop.f32.mrb[1].mxu1 }
 0x190   : > { %v719_v19 = vadd.f32 %v718_v17, %v339_v11  ;;  %v762_v20 = vadd.f32 %v761_v18, %v347_v12  ;;  %v720_v21 = vpop.f32.mrb[2].mxu0  ;;  %v763_v22 = vpop.f32.mrb[2].mxu1 }
 0x191   : > { %768 = vst [vmem:[%s261_s7] sm:$0xff] %v717_v15  ;;  %770 = vst [vmem:[%s261_s7 + $0x10] sm:$0xff] %v760_v16  ;;  %v721_v23 = vadd.f32 %v720_v21, %v335_v9  ;;  %v764_v24 = vadd.f32 %v763_v22, %v343_v10  ;;  %v722_v25 = vpop.f32.mrb[3].mxu0  ;;  %v765_v26 = vpop.f32.mrb[3].mxu1 }
 0x192   : > { %769 = vst [vmem:[%s261_s7 + $0x8] sm:$0xff] %v719_v19  ;;  %771 = vst [vmem:[%s261_s7 + $0x18] sm:$0xff] %v762_v20  ;;  %v723_v27 = vadd.f32 %v722_v25, %v339_v11  ;;  %v766_v28 = vadd.f32 %v765_v26, %v347_v12 }
 0x193   : > { %772 = vst [vmem:[%s261_s7 + $0x20] sm:$0xff] %v721_v23  ;;  %774 = vst [vmem:[%s261_s7 + $0x30] sm:$0xff] %v764_v24 }
 0x194   : > { %773 = vst [vmem:[%s261_s7 + $0x28] sm:$0xff] %v723_v27  ;;  %775 = vst [vmem:[%s261_s7 + $0x38] sm:$0xff] %v766_v28 }
 0x195   : > { %1285 = shalt.err (!%p1282_p8)
}
 0x196   : > { %s1286_s18 = scalar_lea.hbm %s1666_s20, 1024  ;;  %s1290_s30 = scalar_lea.hbm %s1718_s3, 2048 }
 0x197   : > { %p1287_p10 = scmp.ne.s32.totalorder %s1666_s20, %s1286_s18  ;;  %p1291_p3 = scmp.lt.u32.totalorder %s1666_s20, %s1718_s3 }
 0x198   : > { %p1292_p2 = scmp.lt.u32.totalorder %s1290_s30, %s1286_s18  ;;  %p1294_p4 = scmp.lt.u32.totalorder %s1286_s18, %s1666_s20 }
 0x199   : > { %p1288_p13 = pnand %p1287_p10, %p1743_p5 }
 0x19a   : > { %p1293_p11 = por %p1292_p2, %p1291_p3 }
 0x19b   : > { %p1289_p7 = pneg %p1288_p13 }
 0x19c   : > { %p1295_p1 = por %p1294_p4, %p1293_p11 }
 0x19e   : > { %p1296_p12 = pnand %p1295_p1, %p1289_p7 }
 0x1a0   : > { %1299 = shalt.err (!%p1296_p12)
}
 0x1a1   : > { %s1368_s27 = smov 512   ;;  %s1369_s6 = smov 32  }
 0x1a2   : > { %1009 = dma.vmem_to_hbm [thread:$0]  (%p1743_p5), %s1661_s23, 1024, %s1666_s20, %s777_s21, %s1368_s27, %s1368_s27, %s1369_s6  }
 0x1a3 PF: > { %s808_s7 = sand.u32 1, %s1338_s12   ;;  %p1744_p0 = scmp.ne.s32.totalorder %s1733_s4, 0 }
 0x1a4   : > { %p1745_p9 = scmp.ge.s32.totalorder %s1358_s17, 2  ;;  %s809_s26 = scalar_lea.sflag [#allocation4], %s808_s7 }
 0x1a6   : > { %p1023_p6 = pnand %p1745_p9, %p1744_p0 }
 0x1a8   : > { %1333 = dma.done.wait (!%p1023_p6), %s809_s26, 1024  }
 0x1a9   : > { %1335 = vsyncadd (!%p1023_p6), %s809_s26, 4294966272  ;;  %s20_s17 = sadd.s32 1, %s1358_s17   ;;  %s1746_s28 = sld [smem:[#allocation12_spill]] }
 0x1aa   : > { %p17_p8 = scmp.ge.s32.totalorder %s20_s17, 4   ;;  %s1747_s12 = smov %s1342_s13 }
 0x1ab   : > { %s1748_s13 = smov %s1346_s14  ;;  %s1749_s14 = smov %s1438_s24 }
 0x1ac   : > { %s1750_s15 = smov %s1354_s16  ;;  %19 = sbr.rel (!%p17_p8) target bundleno = 9 (0x9), region = 94 }
 0x1af   : > { %s1751_s16 = smov %s1746_s28 }
 0x1b3   :  { %814 = vsyncpa [#allocation3], 1 }
 0x1b4   :  { %816 = vsyncpa [#allocation3 + $0x1], 1 }
 0x1b5   :  { %817 = vsyncpa [#allocation6], 1 }
 0x1b6   :  { %819 = vsyncpa [#allocation6 + $0x1], 1 }
 0x1b7   :  { %820 = vsyncpa [#allocation4], 1 }
 0x1b8   :  { %822 = vsyncpa [#allocation4 + $0x1], 1 }

// kernel: apcb_forward.11
= control target key start
LH: loop header
LB: loop body
LE: loop exit
PB: predicated region body
PF: predicated region fallthrough
CT: control target
= control target key end

     0   :  { %12 = vsyncpa [#allocation3], 0  ;;  %s1085_s0 = inlined_call_operand.hbm [shape: bf16[2,256], index: 0, kind: input, shape index: {}]   ;;  %s1086_s1 = inlined_call_operand.hbm [shape: bf16[256,128], index: 1, kind: input, shape index: {}]   ;;  %s1087_s2 = inlined_call_operand.hbm [shape: f32[1,128], index: 2, kind: input, shape index: {}]   ;;  %s1088_s3 = inlined_call_operand.hbm [shape: bf16[128,128], index: 3, kind: input, shape index: {}]   ;;  %s1089_s4 = inlined_call_operand.hbm [shape: f32[1,128], index: 4, kind: input, shape index: {}]   ;;  %s1090_s5 = inlined_call_operand.hbm [shape: bf16[128,16], index: 5, kind: input, shape index: {}]   ;;  %s1091_s6 = inlined_call_operand.hbm [shape: f32[1,16], index: 6, kind: input, shape index: {}]   ;;  %s1092_s7 = inlined_call_operand.hbm [shape: f32[2,16], index: 7, kind: output, shape index: {}]  }
   0x1   :  { %13 = vsyncpa [#allocation6], 0 }
   0x2   :  { %14 = vsyncpa [#allocation9], 0 }
   0x3   :  { %15 = vsyncpa [#allocation12], 0 }
   0x4   :  { %16 = vsyncpa [#allocation4], 0  ;;  %s909_s24 = smov [#allocation5]   ;;  %s723_s28 = scalar_lea.hbm %s1086_s1, 2048 }
   0x5   :  { %s32_s25 = sshll.u32 %s909_s24, 4  ;;  %p724_p0 = scmp.ne.s32.totalorder %s1086_s1, %s723_s28  ;;  %s33_s25 = int_to_ptr.vmem [resolvable:$true] %s32_s25 }
   0x6   :  { %p727_p1 = scmp.lt.u32.totalorder %s723_s28, %s1086_s1 }
   0x8   :  { %p729_p2 = pnand %p727_p1, %p724_p0 }
   0xa   :  { %732 = shalt.err (!%p729_p2)
}
   0xb   :  { %s733_s10 = scalar_lea.vmem %s33_s25, 2048  ;;  %p738_p4 = scmp.lt.s32.totalorder %s33_s25, %s33_s25 }
   0xc   :  { %p734_p3 = scmp.ne.s32.totalorder %s33_s25, %s733_s10  ;;  %p739_p5 = scmp.lt.s32.totalorder %s733_s10, %s733_s10 }
   0xe   :  { %p740_p6 = por %p739_p5, %p738_p4 }
  0x10   :  { %p741_p7 = pnand %p740_p6, %p734_p3 }
  0x12   :  { %744 = shalt.err (!%p741_p7)
}
  0x13   :  { %s910_s11 = smov 64   ;;  %s911_s12 = smov 4  }
  0x14   :  { %38 = dma.hbm_to_vmem [thread:$0]  %s1086_s1, 2048, %s33_s25, [#allocation6], %s910_s11, %s910_s11, %s911_s12  }
  0x15   :  { %s912_s15 = smov [#allocation8]   ;;  %s913_s17 = smov [#allocation11]  }
  0x16   :  { %s54_s16 = sshll.u32 %s912_s15, 4  ;;  %s76_s18 = sshll.u32 %s913_s17, 4  ;;  %s55_s16 = int_to_ptr.vmem [resolvable:$true] %s54_s16  ;;  %s77_s18 = int_to_ptr.vmem [resolvable:$true] %s76_s18 }
  0x17   :  { %s745_s21 = scalar_lea.hbm %s1088_s3, 1024 }
  0x18   :  { %p746_p8 = scmp.ne.s32.totalorder %s1088_s3, %s745_s21  ;;  %p749_p9 = scmp.lt.u32.totalorder %s745_s21, %s1088_s3 }
  0x1a   :  { %p751_p10 = pnand %p749_p9, %p746_p8 }
  0x1c   :  { %754 = shalt.err (!%p751_p10)
}
  0x1d   :  { %s755_s1 = scalar_lea.vmem %s55_s16, 1024  ;;  %p760_p12 = scmp.lt.s32.totalorder %s55_s16, %s55_s16 }
  0x1e   :  { %p756_p11 = scmp.ne.s32.totalorder %s55_s16, %s755_s1  ;;  %p761_p13 = scmp.lt.s32.totalorder %s755_s1, %s755_s1 }
  0x20   :  { %p762_p0 = por %p761_p13, %p760_p12 }
  0x22   :  { %p763_p1 = pnand %p762_p0, %p756_p11 }
  0x24   :  { %766 = shalt.err (!%p763_p1)
}
  0x25   :  { %60 = dma.hbm_to_vmem [thread:$0]  %s1088_s3, 1024, %s55_s16, [#allocation9], %s910_s11, %s910_s11, %s911_s12  }
  0x26   :  { %s767_s30 = scalar_lea.hbm %s1090_s5, 1024 }
  0x27   :  { %p768_p2 = scmp.ne.s32.totalorder %s1090_s5, %s767_s30  ;;  %p771_p3 = scmp.lt.u32.totalorder %s767_s30, %s1090_s5 }
  0x29   :  { %p773_p4 = pnand %p771_p3, %p768_p2 }
  0x2b   :  { %776 = shalt.err (!%p773_p4)
}
  0x2c   :  { %s777_s14 = scalar_lea.vmem %s77_s18, 1024  ;;  %p782_p6 = scmp.lt.s32.totalorder %s77_s18, %s77_s18 }
  0x2d   :  { %p778_p5 = scmp.ne.s32.totalorder %s77_s18, %s777_s14  ;;  %p783_p7 = scmp.lt.s32.totalorder %s777_s14, %s777_s14 }
  0x2f   :  { %p784_p8 = por %p783_p7, %p782_p6 }
  0x31   :  { %p785_p9 = pnand %p784_p8, %p778_p5 }
  0x33   :  { %788 = shalt.err (!%p785_p9)
}
  0x34   :  { %82 = dma.hbm_to_vmem [thread:$0]  %s1090_s5, 1024, %s77_s18, [#allocation12], %s910_s11, %s910_s11, %s911_s12  }
  0x35   :  { %s914_s16 = smov [#allocation2]   ;;  %s915_s19 = smov [#allocation7]  }
  0x36   :  { %s23_s17 = sshll.u32 %s914_s16, 4  ;;  %s45_s20 = sshll.u32 %s915_s19, 4  ;;  %s24_s17 = int_to_ptr.vmem [resolvable:$true] %s23_s17  ;;  %s46_s20 = int_to_ptr.vmem [resolvable:$true] %s45_s20 }
  0x37   :  { %s789_s23 = scalar_lea.hbm %s1085_s0, 32 }
  0x38   :  { %p790_p10 = scmp.ne.s32.totalorder %s1085_s0, %s789_s23  ;;  %p793_p11 = scmp.lt.u32.totalorder %s789_s23, %s1085_s0 }
  0x3a   :  { %p795_p12 = pnand %p793_p11, %p790_p10 }
  0x3c   :  { %798 = shalt.err (!%p795_p12)
}
  0x3d   :  { %s799_s5 = scalar_lea.vmem %s24_s17, 32  ;;  %p804_p0 = scmp.lt.s32.totalorder %s24_s17, %s24_s17 }
  0x3e   :  { %p800_p13 = scmp.ne.s32.totalorder %s24_s17, %s799_s5  ;;  %p805_p1 = scmp.lt.s32.totalorder %s799_s5, %s799_s5 }
  0x40   :  { %p806_p2 = por %p805_p1, %p804_p0 }
  0x42   :  { %p807_p3 = pnand %p806_p2, %p800_p13 }
  0x44   :  { %810 = shalt.err (!%p807_p3)
}
  0x45   :  { %26 = dma.hbm_to_vmem [thread:$0]  %s1085_s0, 32, %s24_s17, [#allocation3]  }
  0x46   :  { %s811_s28 = scalar_lea.hbm %s1087_s2, 16 }
  0x47   :  { %p812_p4 = scmp.ne.s32.totalorder %s1087_s2, %s811_s28  ;;  %p815_p5 = scmp.lt.u32.totalorder %s811_s28, %s1087_s2 }
  0x49   :  { %p817_p6 = pnand %p815_p5, %p812_p4 }
  0x4b   :  { %820 = shalt.err (!%p817_p6)
}
  0x4c   :  { %s821_s10 = scalar_lea.vmem %s46_s20, 16  ;;  %s825_s13 = scalar_lea.vmem %s46_s20, 32 }
  0x4d   :  { %p822_p7 = scmp.ne.s32.totalorder %s46_s20, %s821_s10  ;;  %p826_p8 = scmp.lt.s32.totalorder %s46_s20, %s46_s20 }
  0x4e   :  { %p827_p9 = scmp.lt.s32.totalorder %s825_s13, %s821_s10 }
  0x50   :  { %p828_p10 = por %p827_p9, %p826_p8 }
  0x52   :  { %p829_p11 = pnand %p828_p10, %p822_p7 }
  0x54   :  { %832 = shalt.err (!%p829_p11)
}
  0x55   :  { %48 = dma.hbm_to_vmem [thread:$0]  %s1087_s2, 16, %s46_s20, [#allocation6]  }
  0x56   :  { %s916_s3 = smov [#allocation10]   ;;  %s917_s16 = smov [#allocation13]  }
  0x57   :  { %s67_s15 = sshll.u32 %s916_s3, 4  ;;  %s89_s17 = sshll.u32 %s917_s16, 4  ;;  %s68_s15 = int_to_ptr.vmem [resolvable:$true] %s67_s15  ;;  %s90_s17 = int_to_ptr.vmem [resolvable:$true] %s89_s17 }
  0x58   :  { %s833_s22 = scalar_lea.hbm %s1089_s4, 16 }
  0x59   :  { %p834_p12 = scmp.ne.s32.totalorder %s1089_s4, %s833_s22  ;;  %p837_p13 = scmp.lt.u32.totalorder %s833_s22, %s1089_s4 }
  0x5b   :  { %p839_p0 = pnand %p837_p13, %p834_p12 }
  0x5d   :  { %842 = shalt.err (!%p839_p0)
}
  0x5e   :  { %s843_s2 = scalar_lea.vmem %s68_s15, 16  ;;  %s847_s20 = scalar_lea.vmem %s68_s15, 32 }
  0x5f   :  { %p844_p1 = scmp.ne.s32.totalorder %s68_s15, %s843_s2  ;;  %p848_p2 = scmp.lt.s32.totalorder %s68_s15, %s68_s15 }
  0x60   :  { %p849_p3 = scmp.lt.s32.totalorder %s847_s20, %s843_s2 }
  0x62   :  { %p850_p4 = por %p849_p3, %p848_p2 }
  0x64   :  { %p851_p5 = pnand %p850_p4, %p844_p1 }
  0x66   :  { %854 = shalt.err (!%p851_p5)
}
  0x67   :  { %70 = dma.hbm_to_vmem [thread:$0]  %s1089_s4, 16, %s68_s15, [#allocation9]  }
  0x68   :  { %s855_s18 = scalar_lea.hbm %s1091_s6, 16 }
  0x69   :  { %p856_p6 = scmp.ne.s32.totalorder %s1091_s6, %s855_s18  ;;  %p859_p7 = scmp.lt.u32.totalorder %s855_s18, %s1091_s6 }
  0x6b   :  { %p861_p8 = pnand %p859_p7, %p856_p6 }
  0x6d   :  { %864 = shalt.err (!%p861_p8)
}
  0x6e   :  { %s865_s8 = scalar_lea.vmem %s90_s17, 16  ;;  %s869_s9 = scalar_lea.vmem %s90_s17, 32 }
  0x6f   :  { %p866_p9 = scmp.ne.s32.totalorder %s90_s17, %s865_s8  ;;  %p870_p10 = scmp.lt.s32.totalorder %s90_s17, %s90_s17 }
  0x70   :  { %p871_p11 = scmp.lt.s32.totalorder %s869_s9, %s865_s8 }
  0x72   :  { %p872_p12 = por %p871_p11, %p870_p10 }
  0x74   :  { %p873_p13 = pnand %p872_p12, %p866_p9 }
  0x76   :  { %876 = shalt.err (!%p873_p13)
}
  0x77   :  { %92 = dma.hbm_to_vmem [thread:$0]  %s1091_s6, 16, %s90_s17, [#allocation12]  }
  0x78   :  { %899 = dma.done.wait [#allocation3], 32  }
  0x79   :  { %900 = vsyncadd [#allocation3], 4294967264 }
  0x7a   :  { %901 = dma.done.wait [#allocation6], 2064  }
  0x7b   :  { %902 = vsyncadd [#allocation6], 4294965232 }
  0x7c   :  { %903 = dma.done.wait [#allocation9], 1040  }
  0x7d   :  { %904 = vsyncadd [#allocation9], 4294966256 }
  0x7e   :  { %905 = dma.done.wait [#allocation12], 1040  }
  0x7f   :  { %906 = vsyncadd [#allocation12], 4294966256  ;;  %v918_v0 = vmov 0.0   ;;  %v691_v1 = vld [vmem:[#allocation5 + $0x40] sm:$0xff]   ;;  %v693_v3 = vld [vmem:[#allocation5 + $0x48] sm:$0xff]   ;;  %v167_v9 = vlaneseq  ;;  %vm920_vm0 = vmmov 0  }
  0x80   :  { %638 = vmatprep.subr.bf16.mxu1 %v918_v0  ;;  %v692_v2 = vld [vmem:[#allocation5] sm:$0xff]   ;;  %598 = vmatprep.subr.bf16.mxu0 %v691_v1  ;;  %v694_v4 = vld [vmem:[#allocation5 + $0x8] sm:$0xff]   ;;  %v695_v5 = vld [vmem:[#allocation5 + $0x50] sm:$0xff]   ;;  %v919_v7 = vmov 1966171168   ;;  %s921_s6 = smov [#allocation14]  }
  0x81   :  { %599 = vmatpush3.bf16.msra.mxu0 %v692_v2  ;;  %v696_v6 = vld [vmem:[#allocation5 + $0x10] sm:$0xff]   ;;  %v165_v8 = vunpack.c.l.s4 %v919_v7  ;;  %v697_v10 = vld [vmem:[#allocation5 + $0x58] sm:$0xff]   ;;  %v168_v13 = vshrl.u32 %v167_v9, 7  ;;  %v699_v14 = vld [vmem:[#allocation5 + $0x60] sm:$0xff]   ;;  %654 = vmatprep.mubr.msk.bf16.mxu1 %vm920_vm0, %v918_v0  ;;  %s550_s13 = sshll.u32 %s921_s6, 4  ;;  %vm542_vm1 = vcmask 123904   ;;  %s551_s13 = int_to_ptr.vmem [resolvable:$true] %s550_s13 }
  0x82   :  { %600 = vmatprep.subr.bf16.mxu0 %v693_v3  ;;  %v698_v11 = vld [vmem:[#allocation5 + $0x18] sm:$0xff]   ;;  %v700_v15 = vld [vmem:[#allocation5 + $0x20] sm:$0xff]   ;;  %v701_v16 = vld [vmem:[#allocation5 + $0x68] sm:$0xff]   ;;  %s877_s0 = scalar_lea.vmem %s551_s13, 32  ;;  %p882_p1 = scmp.lt.s32.totalorder %s551_s13, %s551_s13 }
  0x83   :  { %v166_v12 = vunpack.c.0.s8 %v165_v8  ;;  %v563_v18 = vld.sshfl [vmem:[#allocation2] sm:$0x11 pattern:$0x75316420]  ;;  %v707_v20 = vld [vmem:[#allocation8] sm:$0xff]   ;;  %v708_v23 = vld [vmem:[#allocation8 + $0x8] sm:$0xff]   ;;  %p878_p0 = scmp.ne.s32.totalorder %s551_s13, %s877_s0  ;;  %p883_p2 = scmp.lt.s32.totalorder %s877_s0, %s877_s0 }
  0x84   :  { %v163_v19 = vcombine.high %v563_v18, %v563_v18  ;;  %v702_v21 = vld [vmem:[#allocation5 + $0x28] sm:$0xff]   ;;  %639 = vmatpush3.bf16.msra.mxu1 %v707_v20  ;;  %v703_v24 = vld [vmem:[#allocation5 + $0x70] sm:$0xff]   ;;  %v705_v26 = vld [vmem:[#allocation5 + $0x78] sm:$0xff]  }
  0x85   :  { %601 = vmatpush3.bf16.msra.mxu0 %v694_v4  ;;  %v169_v17 = vsub.s32 %v166_v12, %v168_v13  ;;  %640 = vmatprep.subr.bf16.mxu1 %v918_v0  ;;  %v704_v25 = vld [vmem:[#allocation5 + $0x30] sm:$0xff]   ;;  %v706_v28 = vld [vmem:[#allocation5 + $0x38] sm:$0xff]   ;;  %v711_v31 = vld [vmem:[#allocation8 + $0x20] sm:$0xff]   ;;  %p884_p3 = por %p883_p2, %p882_p1 }
  0x86   :  { %602 = vmatprep.subr.bf16.mxu0 %v695_v5  ;;  %v709_v27 = vld [vmem:[#allocation8 + $0x10] sm:$0xff]   ;;  %v710_v29 = vld [vmem:[#allocation8 + $0x18] sm:$0xff]   ;;  %v712_v32 = vld [vmem:[#allocation8 + $0x28] sm:$0xff]  }
  0x87   :  { %v177_v22 = vrot.slane %v163_v19, %v169_v17  ;;  %v170_v30 = vrot.slane %v563_v18, %v169_v17  ;;  %v713_v33 = vld [vmem:[#allocation8 + $0x30] sm:$0xff]   ;;  %v714_v34 = vld [vmem:[#allocation8 + $0x38] sm:$0xff]   ;;  %v715_v35 = vld [vmem:[#allocation11] sm:$0xff]   ;;  %p885_p4 = pnand %p884_p3, %p878_p0 }
  0x88   :  { %641 = vmatpush3.bf16.msra.mxu1 %v708_v23  ;;  %v716_v36 = vld [vmem:[#allocation11 + $0x8] sm:$0xff]   ;;  %v717_v37 = vld [vmem:[#allocation11 + $0x10] sm:$0xff]   ;;  %v718_v38 = vld [vmem:[#allocation11 + $0x18] sm:$0xff]  }
  0x89   :  { %603 = vmatpush3.bf16.msra.mxu0 %v696_v6  ;;  %308 = vmatprep.mubr.bf16.mxu0 %v177_v22  ;;  %v719_v39 = vld [vmem:[#allocation11 + $0x20] sm:$0xff]   ;;  %v720_v40 = vld [vmem:[#allocation11 + $0x28] sm:$0xff]   ;;  %v562_v42 = vld [vmem:[#allocation7] ss:$0 sm:$0xff] }
  0x8a   :  { %604 = vmatprep.subr.bf16.mxu0 %v697_v10  ;;  %642 = vmatprep.subr.bf16.mxu1 %v918_v0  ;;  %v721_v50 = vld [vmem:[#allocation11 + $0x30] sm:$0xff]   ;;  %v722_v51 = vld [vmem:[#allocation11 + $0x38] sm:$0xff]   ;;  %v589_v60 = vld [vmem:[#allocation13] ss:$0 sm:$0xff] }
  0x8b   :  { %v580_v52 = vld [vmem:[#allocation10] ss:$0 sm:$0xff] }
  0x8c   :  { %643 = vmatpush3.bf16.msra.mxu1 %v709_v27 }
  0x8d   :  { %605 = vmatpush3.bf16.msra.mxu0 %v698_v11  ;;  %644 = vmatprep.subr.bf16.mxu1 %v918_v0 }
  0x8e   :  { %606 = vmatprep.subr.bf16.mxu0 %v699_v14 }
  0x90   :  { %645 = vmatpush3.bf16.msra.mxu1 %v710_v29 }
  0x91   :  { %607 = vmatpush3.bf16.msra.mxu0 %v700_v15  ;;  %646 = vmatprep.subr.bf16.mxu1 %v918_v0 }
  0x92   :  { %608 = vmatprep.subr.bf16.mxu0 %v701_v16 }
  0x94   :  { %647 = vmatpush3.bf16.msra.mxu1 %v711_v31 }
  0x95   :  { %609 = vmatpush3.bf16.msra.mxu0 %v702_v21  ;;  %648 = vmatprep.subr.bf16.mxu1 %v918_v0 }
  0x96   :  { %610 = vmatprep.subr.bf16.mxu0 %v703_v24 }
  0x98   :  { %649 = vmatpush3.bf16.msra.mxu1 %v712_v32 }
  0x99   :  { %611 = vmatpush3.bf16.msra.mxu0 %v704_v25  ;;  %650 = vmatprep.subr.bf16.mxu1 %v918_v0 }
  0x9a   :  { %612 = vmatprep.subr.bf16.mxu0 %v705_v26 }
  0x9c   :  { %651 = vmatpush3.bf16.msra.mxu1 %v713_v33 }
  0x9d   :  { %613 = vmatpush3.bf16.msra.mxu0 %v706_v28  ;;  %652 = vmatprep.subr.bf16.mxu1 %v918_v0 }
  0x9e   :  { %658 = vmatprep.subr.bf16.mxu0 %v918_v0 }
  0xa0   :  { %309 = vmatmul.mubr.bf16.vlgmr.msra.gmra.mrb[0].mxu0 %v170_v30  ;;  %653 = vmatpush3.bf16.msra.mxu1 %v714_v34 }
  0xa1   :  { %674 = vmatprep.mubr.msk.bf16.mxu0 %vm920_vm0, %v918_v0  ;;  %659 = vmatpush3.bf16.msra.mxu0 %v715_v35 }
  0xa2   :  { %660 = vmatprep.subr.bf16.mxu0 %v918_v0 }
  0xa5   :  { %661 = vmatpush3.bf16.msra.mxu0 %v716_v36 }
  0xa6   :  { %662 = vmatprep.subr.bf16.mxu0 %v918_v0 }
  0xa9   :  { %663 = vmatpush3.bf16.msra.mxu0 %v717_v37 }
  0xaa   :  { %664 = vmatprep.subr.bf16.mxu0 %v918_v0 }
  0xad   :  { %665 = vmatpush3.bf16.msra.mxu0 %v718_v38 }
  0xae   :  { %666 = vmatprep.subr.bf16.mxu0 %v918_v0 }
  0xb1   :  { %667 = vmatpush3.bf16.msra.mxu0 %v719_v39 }
  0xb2   :  { %668 = vmatprep.subr.bf16.mxu0 %v918_v0 }
  0xb5   :  { %669 = vmatpush3.bf16.msra.mxu0 %v720_v40 }
  0xb6   :  { %670 = vmatprep.subr.bf16.mxu0 %v918_v0 }
  0xb9   :  { %671 = vmatpush3.bf16.msra.mxu0 %v721_v50 }
  0xba   :  { %672 = vmatprep.subr.bf16.mxu0 %v918_v0 }
  0xbd   :  { %673 = vmatpush3.bf16.msra.mxu0 %v722_v51 }
 0x173   :  { %v614_v41 = vpop.f32.mrb[0].mxu0 }
 0x174   :  { %v615_v43 = vpop.f32.mrb[1].mxu0 }
 0x175   :  { %v616_v44 = vadd.f32 %v615_v43, %v614_v41  ;;  %v617_v45 = vpop.f32.mrb[2].mxu0 }
 0x176   :  { %v618_v46 = vpop.f32.mrb[3].mxu0 }
 0x177   :  { %v311_v47 = vadd.f32 %v616_v44, %v562_v42 }
 0x179   :  { %v316_v48 = vmax.f32 %v311_v47, 0.0 }
 0x17b   :  { %v317_v49 = vpack.c.bf16 %v316_v48, %v316_v48 }
 0x17d   :  { %655 = vmatmul.mubr.bf16.vlgmr.msra.gmra.mrb[0].mxu1 %v317_v49 }
 0x250   :  { %v423_v53 = vpop.f32.mrb[0].mxu1 }
 0x251   :  { %v424_v54 = vadd.f32 %v580_v52, %v423_v53  ;;  %v656_v55 = vpop.f32.mrb[1].mxu1 }
 0x252   :  { %v426_v56 = vpop.f32.mrb[2].mxu1 }
 0x253   :  { %v429_v57 = vmax.f32 %v424_v54, 0.0  ;;  %v657_v58 = vpop.f32.mrb[3].mxu1 }
 0x255   :  { %v430_v59 = vpack.c.bf16 %v429_v57, %v429_v57 }
 0x257   :  { %675 = vmatmul.mubr.bf16.vlgmr.msra.gmra.mrb[4].mxu0 %v430_v59 }
 0x32a   :  { %v536_v61 = vpop.f32.mrb[4].mxu0 }
 0x32b   :  { %v537_v62 = vadd.f32 %v589_v60, %v536_v61  ;;  %v676_v63 = vpop.f32.mrb[5].mxu0 }
 0x32c   :  { %v539_v0 = vpop.f32.mrb[6].mxu0 }
 0x32d   :  { %v677_v1 = vpop.f32.mrb[7].mxu0  ;;  %543 = vst.msk [vmem:[#allocation14] sm:$0x3] %vm542_vm1, %v537_v62 }
 0x32e   :  { %888 = shalt.err (!%p885_p4)
}
 0x32f   :  { %s889_s15 = scalar_lea.hbm %s1092_s7, 32 }
 0x330   :  { %p890_p5 = scmp.ne.s32.totalorder %s1092_s7, %s889_s15  ;;  %p893_p6 = scmp.lt.u32.totalorder %s889_s15, %s1092_s7 }
 0x332   :  { %p895_p7 = pnand %p893_p6, %p890_p5 }
 0x334   :  { %898 = shalt.err (!%p895_p7)
}
 0x335   :  { %553 = dma.vmem_to_hbm [thread:$0]  %s551_s13, 32, %s1092_s7, [#allocation4]  }
 0x336   :  { %907 = dma.done.wait [#allocation4], 32  }
 0x337   :  { %908 = vsyncadd [#allocation4], 4294967264 }
 0x338   :  { %557 = vsyncpa [#allocation3], 1 }
 0x339   :  { %558 = vsyncpa [#allocation6], 1 }
 0x33a   :  { %559 = vsyncpa [#allocation9], 1 }
 0x33b   :  { %560 = vsyncpa [#allocation12], 1 }
 0x33c   :  { %561 = vsyncpa [#allocation4], 1 }

</bundles_post_ra>
